<compile_context>
chip_gen: v5e
topology: v5e:2x2
jax: 0.10.0
libtpu: 0.0.40
codegen_flags: <defaults>
</compile_context>

<pallas_src>
import jax
import jax.numpy as jnp
from jax import lax
from jax.experimental import pallas as pl
from jax.experimental.pallas import tpu as pltpu

BN_EPS = 1e-5
_PADL = 8  # left pad (in sublanes) of the conv2 staging buffer -> aligned interior store


# ------------------------------ Pallas kernel -------------------------------

def _bottleneck_kernel(x_ref, w1_ref, b1_ref, w2_ref, b2_ref, w3_ref, b3_ref,
                       o_ref, pad_ref):
    # x_ref   : (1, H, W, Cin)  bf16
    # w1_ref  : (Cin, P)        bf16  (BN1 scale folded in)
    # w2_ref  : (9, P, P)       bf16  (BN2 scale folded in)
    # w3_ref  : (P, Cexp)       bf16  (BN3 scale folded in)
    # b*_ref  : (1, C)          f32
    # o_ref   : (1, H, W, Cexp) f32
    # pad_ref : (H+2, W+2*_PADL, P) f32 VMEM scratch (zero-padded conv1 output)
    _, H, W, cin = x_ref.shape
    planes = w1_ref.shape[1]
    cexp = w3_ref.shape[1]

    x = x_ref[0]                                  # (H, W, Cin) bf16
    x2d = x.reshape(H * W, cin)

    # ---- conv1 (1x1) + folded BN1 + ReLU -> f32 --------------------------------
    y1 = jnp.dot(x2d, w1_ref[...], preferred_element_type=jnp.float32)
    y1 = jnp.maximum(y1 + b1_ref[...], 0.0)       # (H*W, P) f32

    # ---- stage conv1 output into a zero-padded VMEM buffer for the 3x3 conv ----
    pad_ref[...] = jnp.zeros(pad_ref.shape, jnp.float32)
    pad_ref[1:H + 1, _PADL:_PADL + W, :] = y1.reshape(H, W, planes)

    # ---- conv2 (3x3, stride 1, pad 1) as 9 shifted MXU matmuls, f32 accumulator -
    acc = jnp.zeros((H * W, planes), jnp.float32)
    for kh in range(3):
        for kw in range(3):
            c0 = _PADL - 1 + kw
            win = pad_ref[kh:kh + H, c0:c0 + W, :]           # (H, W, P) f32
            win2d = win.reshape(H * W, planes).astype(jnp.bfloat16)
            acc = acc + jnp.dot(win2d, w2_ref[kh * 3 + kw],
                                preferred_element_type=jnp.float32)
    y2 = jnp.maximum(acc + b2_ref[...], 0.0).astype(jnp.bfloat16)   # (H*W, P)

    # ---- conv3 (1x1 expand) + folded BN3 + residual + ReLU ----------------------
    y3 = jnp.dot(y2, w3_ref[...], preferred_element_type=jnp.float32)
    y3 = y3 + b3_ref[...] + x2d.astype(jnp.float32)
    o_ref[0] = jnp.maximum(y3, 0.0).reshape(H, W, cexp)


# --------------------------- Bottleneck forward ------------------------------

def _fold_bn(p):
    scale = p["gamma"] / jnp.sqrt(p["var"] + BN_EPS)
    bias = p["beta"] - p["mean"] * scale
    return scale, bias


def bottleneck_forward(x_nchw, params):
    """Pallas implementation of Bottleneck.forward (stride=1, downsample=None)."""
    N, C, H, W = x_nchw.shape
    planes = params["w1_pt"].shape[0]
    cexp = params["w3_pt"].shape[0]
    assert cexp == C, "residual add requires planes * expansion == inplanes (downsample=None)"
    assert W % 8 == 0, "W must be a multiple of 8 for layout-preserving in-kernel reshapes"

    # NCHW -> NHWC, bf16 activations.
    # TODO(synk): in a full network keep activations NHWC end-to-end and drop these transposes.
    x = jnp.transpose(x_nchw, (0, 2, 3, 1)).astype(jnp.bfloat16)

    s1, b1 = _fold_bn(params["bn1"])
    s2, b2 = _fold_bn(params["bn2"])
    s3, b3 = _fold_bn(params["bn3"])

    # Fold BN scale into the conv weights (per output channel), then cast to bf16.
    w1 = (params["w1_pt"].reshape(planes, C).T * s1[None, :]).astype(jnp.bfloat16)
    w2 = (jnp.transpose(params["w2_pt"], (2, 3, 1, 0)).reshape(9, planes, planes)
          * s2[None, None, :]).astype(jnp.bfloat16)
    w3 = (params["w3_pt"].reshape(cexp, planes).T * s3[None, :]).astype(jnp.bfloat16)
    b1 = b1.reshape(1, planes).astype(jnp.float32)
    b2 = b2.reshape(1, planes).astype(jnp.float32)
    b3 = b3.reshape(1, cexp).astype(jnp.float32)

    wp = W + 2 * _PADL  # padded width of the conv2 staging buffer

    out = pl.pallas_call(
        _bottleneck_kernel,
        out_shape=jax.ShapeDtypeStruct((N, H, W, cexp), jnp.float32),
        grid_spec=pltpu.PrefetchScalarGridSpec(
            num_scalar_prefetch=0,
            grid=(N,),
            in_specs=[
                pl.BlockSpec((1, H, W, C), lambda n: (n, 0, 0, 0)),       # activations
                pl.BlockSpec((C, planes), lambda n: (0, 0)),              # w1 (resident)
                pl.BlockSpec((1, planes), lambda n: (0, 0)),              # b1
                pl.BlockSpec((9, planes, planes), lambda n: (0, 0, 0)),   # w2 (resident)
                pl.BlockSpec((1, planes), lambda n: (0, 0)),              # b2
                pl.BlockSpec((planes, cexp), lambda n: (0, 0)),           # w3 (resident)
                pl.BlockSpec((1, cexp), lambda n: (0, 0)),                # b3
            ],
            out_specs=pl.BlockSpec((1, H, W, cexp), lambda n: (n, 0, 0, 0)),
            scratch_shapes=[pltpu.VMEM((H + 2, wp, planes), jnp.float32)],
        ),
        compiler_params=pltpu.CompilerParams(
            dimension_semantics=("parallel",),
            vmem_limit_bytes=64 * 1024 * 1024,
        ),
    )(x, w1, b1, w2, b2, w3, b3)

    return jnp.transpose(out, (0, 3, 1, 2))        # back to NCHW


# ------------------------------ JAX reference --------------------------------

def reference_forward(x, params):
    def conv(x, w, pad=0):
        return lax.conv_general_dilated(
            x, w, (1, 1), [(pad, pad), (pad, pad)],
            dimension_numbers=("NCHW", "OIHW", "NCHW"))

    def bn(x, p):
        s = p["gamma"] / jnp.sqrt(p["var"] + BN_EPS)
        b = p["beta"] - p["mean"] * s
        return x * s[None, :, None, None] + b[None, :, None, None]

    out = jax.nn.relu(bn(conv(x, params["w1_pt"]), params["bn1"]))
    out = jax.nn.relu(bn(conv(out, params["w2_pt"], pad=1), params["bn2"]))
    out = bn(conv(out, params["w3_pt"]), params["bn3"])
    return jax.nn.relu(out + x)


# ---------------------------------- main --------------------------------------

def make_params(key, inplanes, planes, expansion=4):
    cexp = planes * expansion
    keys = jax.random.split(key, 6)

    def bn_params(k, c):
        k1, k2, k3, k4 = jax.random.split(k, 4)
        return dict(
            gamma=jax.random.uniform(k1, (c,), jnp.float32, 0.5, 1.5),
            beta=jax.random.normal(k2, (c,), jnp.float32) * 0.1,
            mean=jax.random.normal(k3, (c,), jnp.float32) * 0.1,
            var=jax.random.uniform(k4, (c,), jnp.float32, 0.5, 1.5),
        )

    return dict(
        w1_pt=jax.random.normal(keys[0], (planes, inplanes, 1, 1), jnp.float32) * 0.1,
        w2_pt=jax.random.normal(keys[1], (planes, planes, 3, 3), jnp.float32) * 0.1,
        w3_pt=jax.random.normal(keys[2], (cexp, planes, 1, 1), jnp.float32) * 0.1,
        bn1=bn_params(keys[3], planes),
        bn2=bn_params(keys[4], planes),
        bn3=bn_params(keys[5], cexp),
    )


if __name__ == "__main__":
    key = jax.random.PRNGKey(0)
    kx, kp = jax.random.split(key)

    # planes * expansion == inplanes so the (downsample=None) residual add is valid.
    inplanes, planes = 64, 16
    N, H, W = 2, 16, 16
    x = jax.random.normal(kx, (N, inplanes, H, W), jnp.float32)
    params = make_params(kp, inplanes, planes)

    out = jax.block_until_ready(bottleneck_forward(x, params))
    ref = jax.block_until_ready(reference_forward(x, params))

    assert out.shape == ref.shape == (N, inplanes, H, W)
    max_err = float(jnp.max(jnp.abs(out - ref)))
    # bf16 activations/weights with f32 accumulation -> small drift vs the f32 reference.
    assert max_err < 1e-1, max_err

    print("KERNEL_OK")
</pallas_src>

<mosaic_0001>
module attributes {stable_mosaic.version = 11 : i64} {
  func.func @_bottleneck_kernel(%arg0: i32, %arg1: memref<1x16x16x64xbf16, #tpu.memory_space<vmem>>, %arg2: memref<64x16xbf16, #tpu.memory_space<vmem>>, %arg3: memref<1x16xf32, #tpu.memory_space<vmem>>, %arg4: memref<9x16x16xbf16, #tpu.memory_space<vmem>>, %arg5: memref<1x16xf32, #tpu.memory_space<vmem>>, %arg6: memref<16x64xbf16, #tpu.memory_space<vmem>>, %arg7: memref<1x64xf32, #tpu.memory_space<vmem>>, %arg8: memref<1x16x16x64xf32, #tpu.memory_space<vmem>>, %arg9: memref<18x32x16xf32, #tpu.memory_space<vmem>>) attributes {dimension_semantics = [#tpu.dimension_semantics<parallel>], iteration_bounds = array<i64: 2>, scalar_prefetch = 0 : i64, scratch_operands = 1 : i64, tpu.core_type = #tpu.core_type<tc>, window_params = [{transform_indices = @transform_0, window_bounds = array<i64: 1, 16, 16, 64>}, {pipeline_mode = #tpu.pipeline_mode<synchronous>, transform_indices = @transform_1, window_bounds = array<i64: 64, 16>}, {pipeline_mode = #tpu.pipeline_mode<synchronous>, transform_indices = @transform_2, window_bounds = array<i64: 1, 16>}, {pipeline_mode = #tpu.pipeline_mode<synchronous>, transform_indices = @transform_3, window_bounds = array<i64: 9, 16, 16>}, {pipeline_mode = #tpu.pipeline_mode<synchronous>, transform_indices = @transform_4, window_bounds = array<i64: 1, 16>}, {pipeline_mode = #tpu.pipeline_mode<synchronous>, transform_indices = @transform_5, window_bounds = array<i64: 16, 64>}, {pipeline_mode = #tpu.pipeline_mode<synchronous>, transform_indices = @transform_6, window_bounds = array<i64: 1, 64>}, {transform_indices = @transform_7, window_bounds = array<i64: 1, 16, 16, 64>}]} {
    %c0 = arith.constant 0 : index
    %c0_0 = arith.constant 0 : index
    %c0_1 = arith.constant 0 : index
    %c0_2 = arith.constant 0 : index
    %0 = vector.load %arg1[%c0, %c0_0, %c0_1, %c0_2] : memref<1x16x16x64xbf16, #tpu.memory_space<vmem>>, vector<1x16x16x64xbf16>
    %1 = vector.shape_cast %0 : vector<1x16x16x64xbf16> to vector<16x16x64xbf16>
    %2 = vector.shape_cast %1 : vector<16x16x64xbf16> to vector<256x64xbf16>
    %c0_3 = arith.constant 0 : index
    %c0_4 = arith.constant 0 : index
    %3 = vector.load %arg2[%c0_3, %c0_4] : memref<64x16xbf16, #tpu.memory_space<vmem>>, vector<64x16xbf16>
    %cst = arith.constant dense<0.000000e+00> : vector<256x16xf32>
    %4 = tpu.matmul %2, %3, %cst {dimension_numbers = #tpu.dot_dimension_numbers<[1], [0], [0], [1], [0, 0, 1, 1], [], []>} : vector<256x64xbf16>, vector<64x16xbf16>, vector<256x16xf32> -> vector<256x16xf32>
    %c0_5 = arith.constant 0 : index
    %c0_6 = arith.constant 0 : index
    %5 = vector.load %arg3[%c0_5, %c0_6] : memref<1x16xf32, #tpu.memory_space<vmem>>, vector<1x16xf32>
    %6 = vector.broadcast %5 : vector<1x16xf32> to vector<256x16xf32>
    %7 = arith.addf %4, %6 : vector<256x16xf32>
    %cst_7 = arith.constant 0.000000e+00 : f32
    %8 = vector.broadcast %cst_7 : f32 to vector<256x16xf32>
    %9 = arith.maximumf %7, %8 : vector<256x16xf32>
    %cst_8 = arith.constant 0.000000e+00 : f32
    %10 = vector.broadcast %cst_8 : f32 to vector<18x32x16xf32>
    %c0_9 = arith.constant 0 : index
    %c0_10 = arith.constant 0 : index
    %c0_11 = arith.constant 0 : index
    %11 = vector.load %arg9[%c0_9, %c0_10, %c0_11] : memref<18x32x16xf32, #tpu.memory_space<vmem>>, vector<18x32x16xf32>
    tpu.vector_store %arg9[%c0_9, %c0_10, %c0_11], %10 {strides = array<i32>} : memref<18x32x16xf32, #tpu.memory_space<vmem>>, vector<18x32x16xf32>,
    %12 = vector.shape_cast %9 : vector<256x16xf32> to vector<16x16x16xf32>
    %c1 = arith.constant 1 : index
    %c8 = arith.constant 8 : index
    %c0_12 = arith.constant 0 : index
    %13 = vector.load %arg9[%c1, %c8, %c0_12] : memref<18x32x16xf32, #tpu.memory_space<vmem>>, vector<16x16x16xf32>
    tpu.vector_store %arg9[%c1, %c8, %c0_12], %12 {strides = array<i32>} : memref<18x32x16xf32, #tpu.memory_space<vmem>>, vector<16x16x16xf32>,
    %cst_13 = arith.constant 0.000000e+00 : f32
    %14 = vector.broadcast %cst_13 : f32 to vector<256x16xf32>
    %c0_14 = arith.constant 0 : index
    %c7 = arith.constant 7 : index
    %c0_15 = arith.constant 0 : index
    %15 = vector.load %arg9[%c0_14, %c7, %c0_15] : memref<18x32x16xf32, #tpu.memory_space<vmem>>, vector<16x16x16xf32>
    %16 = vector.shape_cast %15 : vector<16x16x16xf32> to vector<256x16xf32>
    %17 = arith.truncf %16 : vector<256x16xf32> to vector<256x16xbf16>
    %c0_16 = arith.constant 0 : index
    %c0_17 = arith.constant 0 : index
    %c0_18 = arith.constant 0 : index
    %18 = vector.load %arg4[%c0_16, %c0_17, %c0_18] : memref<9x16x16xbf16, #tpu.memory_space<vmem>>, vector<1x16x16xbf16>
    %19 = vector.shape_cast %18 : vector<1x16x16xbf16> to vector<16x16xbf16>
    %cst_19 = arith.constant dense<0.000000e+00> : vector<256x16xf32>
    %20 = tpu.matmul %17, %19, %cst_19 {dimension_numbers = #tpu.dot_dimension_numbers<[1], [0], [0], [1], [0, 0, 1, 1], [], []>} : vector<256x16xbf16>, vector<16x16xbf16>, vector<256x16xf32> -> vector<256x16xf32>
    %21 = arith.addf %14, %20 : vector<256x16xf32>
    %c0_20 = arith.constant 0 : index
    %c8_21 = arith.constant 8 : index
    %c0_22 = arith.constant 0 : index
    %22 = vector.load %arg9[%c0_20, %c8_21, %c0_22] : memref<18x32x16xf32, #tpu.memory_space<vmem>>, vector<16x16x16xf32>
    %23 = vector.shape_cast %22 : vector<16x16x16xf32> to vector<256x16xf32>
    %24 = arith.truncf %23 : vector<256x16xf32> to vector<256x16xbf16>
    %c1_23 = arith.constant 1 : index
    %c0_24 = arith.constant 0 : index
    %c0_25 = arith.constant 0 : index
    %25 = vector.load %arg4[%c1_23, %c0_24, %c0_25] : memref<9x16x16xbf16, #tpu.memory_space<vmem>>, vector<1x16x16xbf16>
    %26 = vector.shape_cast %25 : vector<1x16x16xbf16> to vector<16x16xbf16>
    %cst_26 = arith.constant dense<0.000000e+00> : vector<256x16xf32>
    %27 = tpu.matmul %24, %26, %cst_26 {dimension_numbers = #tpu.dot_dimension_numbers<[1], [0], [0], [1], [0, 0, 1, 1], [], []>} : vector<256x16xbf16>, vector<16x16xbf16>, vector<256x16xf32> -> vector<256x16xf32>
    %28 = arith.addf %21, %27 : vector<256x16xf32>
    %c0_27 = arith.constant 0 : index
    %c9 = arith.constant 9 : index
    %c0_28 = arith.constant 0 : index
    %29 = vector.load %arg9[%c0_27, %c9, %c0_28] : memref<18x32x16xf32, #tpu.memory_space<vmem>>, vector<16x16x16xf32>
    %30 = vector.shape_cast %29 : vector<16x16x16xf32> to vector<256x16xf32>
    %31 = arith.truncf %30 : vector<256x16xf32> to vector<256x16xbf16>
    %c2 = arith.constant 2 : index
    %c0_29 = arith.constant 0 : index
    %c0_30 = arith.constant 0 : index
    %32 = vector.load %arg4[%c2, %c0_29, %c0_30] : memref<9x16x16xbf16, #tpu.memory_space<vmem>>, vector<1x16x16xbf16>
    %33 = vector.shape_cast %32 : vector<1x16x16xbf16> to vector<16x16xbf16>
    %cst_31 = arith.constant dense<0.000000e+00> : vector<256x16xf32>
    %34 = tpu.matmul %31, %33, %cst_31 {dimension_numbers = #tpu.dot_dimension_numbers<[1], [0], [0], [1], [0, 0, 1, 1], [], []>} : vector<256x16xbf16>, vector<16x16xbf16>, vector<256x16xf32> -> vector<256x16xf32>
    %35 = arith.addf %28, %34 : vector<256x16xf32>
    %c1_32 = arith.constant 1 : index
    %c7_33 = arith.constant 7 : index
    %c0_34 = arith.constant 0 : index
    %36 = vector.load %arg9[%c1_32, %c7_33, %c0_34] : memref<18x32x16xf32, #tpu.memory_space<vmem>>, vector<16x16x16xf32>
    %37 = vector.shape_cast %36 : vector<16x16x16xf32> to vector<256x16xf32>
    %38 = arith.truncf %37 : vector<256x16xf32> to vector<256x16xbf16>
    %c3 = arith.constant 3 : index
    %c0_35 = arith.constant 0 : index
    %c0_36 = arith.constant 0 : index
    %39 = vector.load %arg4[%c3, %c0_35, %c0_36] : memref<9x16x16xbf16, #tpu.memory_space<vmem>>, vector<1x16x16xbf16>
    %40 = vector.shape_cast %39 : vector<1x16x16xbf16> to vector<16x16xbf16>
    %cst_37 = arith.constant dense<0.000000e+00> : vector<256x16xf32>
    %41 = tpu.matmul %38, %40, %cst_37 {dimension_numbers = #tpu.dot_dimension_numbers<[1], [0], [0], [1], [0, 0, 1, 1], [], []>} : vector<256x16xbf16>, vector<16x16xbf16>, vector<256x16xf32> -> vector<256x16xf32>
    %42 = arith.addf %35, %41 : vector<256x16xf32>
    %c1_38 = arith.constant 1 : index
    %c8_39 = arith.constant 8 : index
    %c0_40 = arith.constant 0 : index
    %43 = vector.load %arg9[%c1_38, %c8_39, %c0_40] : memref<18x32x16xf32, #tpu.memory_space<vmem>>, vector<16x16x16xf32>
    %44 = vector.shape_cast %43 : vector<16x16x16xf32> to vector<256x16xf32>
    %45 = arith.truncf %44 : vector<256x16xf32> to vector<256x16xbf16>
    %c4 = arith.constant 4 : index
    %c0_41 = arith.constant 0 : index
    %c0_42 = arith.constant 0 : index
    %46 = vector.load %arg4[%c4, %c0_41, %c0_42] : memref<9x16x16xbf16, #tpu.memory_space<vmem>>, vector<1x16x16xbf16>
    %47 = vector.shape_cast %46 : vector<1x16x16xbf16> to vector<16x16xbf16>
    %cst_43 = arith.constant dense<0.000000e+00> : vector<256x16xf32>
    %48 = tpu.matmul %45, %47, %cst_43 {dimension_numbers = #tpu.dot_dimension_numbers<[1], [0], [0], [1], [0, 0, 1, 1], [], []>} : vector<256x16xbf16>, vector<16x16xbf16>, vector<256x16xf32> -> vector<256x16xf32>
    %49 = arith.addf %42, %48 : vector<256x16xf32>
    %c1_44 = arith.constant 1 : index
    %c9_45 = arith.constant 9 : index
    %c0_46 = arith.constant 0 : index
    %50 = vector.load %arg9[%c1_44, %c9_45, %c0_46] : memref<18x32x16xf32, #tpu.memory_space<vmem>>, vector<16x16x16xf32>
    %51 = vector.shape_cast %50 : vector<16x16x16xf32> to vector<256x16xf32>
    %52 = arith.truncf %51 : vector<256x16xf32> to vector<256x16xbf16>
    %c5 = arith.constant 5 : index
    %c0_47 = arith.constant 0 : index
    %c0_48 = arith.constant 0 : index
    %53 = vector.load %arg4[%c5, %c0_47, %c0_48] : memref<9x16x16xbf16, #tpu.memory_space<vmem>>, vector<1x16x16xbf16>
    %54 = vector.shape_cast %53 : vector<1x16x16xbf16> to vector<16x16xbf16>
    %cst_49 = arith.constant dense<0.000000e+00> : vector<256x16xf32>
    %55 = tpu.matmul %52, %54, %cst_49 {dimension_numbers = #tpu.dot_dimension_numbers<[1], [0], [0], [1], [0, 0, 1, 1], [], []>} : vector<256x16xbf16>, vector<16x16xbf16>, vector<256x16xf32> -> vector<256x16xf32>
    %56 = arith.addf %49, %55 : vector<256x16xf32>
    %c2_50 = arith.constant 2 : index
    %c7_51 = arith.constant 7 : index
    %c0_52 = arith.constant 0 : index
    %57 = vector.load %arg9[%c2_50, %c7_51, %c0_52] : memref<18x32x16xf32, #tpu.memory_space<vmem>>, vector<16x16x16xf32>
    %58 = vector.shape_cast %57 : vector<16x16x16xf32> to vector<256x16xf32>
    %59 = arith.truncf %58 : vector<256x16xf32> to vector<256x16xbf16>
    %c6 = arith.constant 6 : index
    %c0_53 = arith.constant 0 : index
    %c0_54 = arith.constant 0 : index
    %60 = vector.load %arg4[%c6, %c0_53, %c0_54] : memref<9x16x16xbf16, #tpu.memory_space<vmem>>, vector<1x16x16xbf16>
    %61 = vector.shape_cast %60 : vector<1x16x16xbf16> to vector<16x16xbf16>
    %cst_55 = arith.constant dense<0.000000e+00> : vector<256x16xf32>
    %62 = tpu.matmul %59, %61, %cst_55 {dimension_numbers = #tpu.dot_dimension_numbers<[1], [0], [0], [1], [0, 0, 1, 1], [], []>} : vector<256x16xbf16>, vector<16x16xbf16>, vector<256x16xf32> -> vector<256x16xf32>
    %63 = arith.addf %56, %62 : vector<256x16xf32>
    %c2_56 = arith.constant 2 : index
    %c8_57 = arith.constant 8 : index
    %c0_58 = arith.constant 0 : index
    %64 = vector.load %arg9[%c2_56, %c8_57, %c0_58] : memref<18x32x16xf32, #tpu.memory_space<vmem>>, vector<16x16x16xf32>
    %65 = vector.shape_cast %64 : vector<16x16x16xf32> to vector<256x16xf32>
    %66 = arith.truncf %65 : vector<256x16xf32> to vector<256x16xbf16>
    %c7_59 = arith.constant 7 : index
    %c0_60 = arith.constant 0 : index
    %c0_61 = arith.constant 0 : index
    %67 = vector.load %arg4[%c7_59, %c0_60, %c0_61] : memref<9x16x16xbf16, #tpu.memory_space<vmem>>, vector<1x16x16xbf16>
    %68 = vector.shape_cast %67 : vector<1x16x16xbf16> to vector<16x16xbf16>
    %cst_62 = arith.constant dense<0.000000e+00> : vector<256x16xf32>
    %69 = tpu.matmul %66, %68, %cst_62 {dimension_numbers = #tpu.dot_dimension_numbers<[1], [0], [0], [1], [0, 0, 1, 1], [], []>} : vector<256x16xbf16>, vector<16x16xbf16>, vector<256x16xf32> -> vector<256x16xf32>
    %70 = arith.addf %63, %69 : vector<256x16xf32>
    %c2_63 = arith.constant 2 : index
    %c9_64 = arith.constant 9 : index
    %c0_65 = arith.constant 0 : index
    %71 = vector.load %arg9[%c2_63, %c9_64, %c0_65] : memref<18x32x16xf32, #tpu.memory_space<vmem>>, vector<16x16x16xf32>
    %72 = vector.shape_cast %71 : vector<16x16x16xf32> to vector<256x16xf32>
    %73 = arith.truncf %72 : vector<256x16xf32> to vector<256x16xbf16>
    %c8_66 = arith.constant 8 : index
    %c0_67 = arith.constant 0 : index
    %c0_68 = arith.constant 0 : index
    %74 = vector.load %arg4[%c8_66, %c0_67, %c0_68] : memref<9x16x16xbf16, #tpu.memory_space<vmem>>, vector<1x16x16xbf16>
    %75 = vector.shape_cast %74 : vector<1x16x16xbf16> to vector<16x16xbf16>
    %cst_69 = arith.constant dense<0.000000e+00> : vector<256x16xf32>
    %76 = tpu.matmul %73, %75, %cst_69 {dimension_numbers = #tpu.dot_dimension_numbers<[1], [0], [0], [1], [0, 0, 1, 1], [], []>} : vector<256x16xbf16>, vector<16x16xbf16>, vector<256x16xf32> -> vector<256x16xf32>
    %77 = arith.addf %70, %76 : vector<256x16xf32>
    %c0_70 = arith.constant 0 : index
    %c0_71 = arith.constant 0 : index
    %78 = vector.load %arg5[%c0_70, %c0_71] : memref<1x16xf32, #tpu.memory_space<vmem>>, vector<1x16xf32>
    %79 = vector.broadcast %78 : vector<1x16xf32> to vector<256x16xf32>
    %80 = arith.addf %77, %79 : vector<256x16xf32>
    %cst_72 = arith.constant 0.000000e+00 : f32
    %81 = vector.broadcast %cst_72 : f32 to vector<256x16xf32>
    %82 = arith.maximumf %80, %81 : vector<256x16xf32>
    %83 = arith.truncf %82 : vector<256x16xf32> to vector<256x16xbf16>
    %c0_73 = arith.constant 0 : index
    %c0_74 = arith.constant 0 : index
    %84 = vector.load %arg6[%c0_73, %c0_74] : memref<16x64xbf16, #tpu.memory_space<vmem>>, vector<16x64xbf16>
    %cst_75 = arith.constant dense<0.000000e+00> : vector<256x64xf32>
    %85 = tpu.matmul %83, %84, %cst_75 {dimension_numbers = #tpu.dot_dimension_numbers<[1], [0], [0], [1], [0, 0, 1, 1], [], []>} : vector<256x16xbf16>, vector<16x64xbf16>, vector<256x64xf32> -> vector<256x64xf32>
    %c0_76 = arith.constant 0 : index
    %c0_77 = arith.constant 0 : index
    %86 = vector.load %arg7[%c0_76, %c0_77] : memref<1x64xf32, #tpu.memory_space<vmem>>, vector<1x64xf32>
    %87 = vector.broadcast %86 : vector<1x64xf32> to vector<256x64xf32>
    %88 = arith.addf %85, %87 : vector<256x64xf32>
    %89 = arith.extf %2 : vector<256x64xbf16> to vector<256x64xf32>
    %90 = arith.addf %88, %89 : vector<256x64xf32>
    %cst_78 = arith.constant 0.000000e+00 : f32
    %91 = vector.broadcast %cst_78 : f32 to vector<256x64xf32>
    %92 = arith.maximumf %90, %91 : vector<256x64xf32>
    %93 = vector.shape_cast %92 : vector<256x64xf32> to vector<16x16x64xf32>
    %c0_79 = arith.constant 0 : index
    %c0_80 = arith.constant 0 : index
    %c0_81 = arith.constant 0 : index
    %c0_82 = arith.constant 0 : index
    %94 = vector.load %arg8[%c0_79, %c0_80, %c0_81, %c0_82] : memref<1x16x16x64xf32, #tpu.memory_space<vmem>>, vector<1x16x16x64xf32>
    %95 = vector.shape_cast %94 : vector<1x16x16x64xf32> to vector<16x16x64xf32>
    %96 = vector.shape_cast %93 : vector<16x16x64xf32> to vector<1x16x16x64xf32>
    tpu.vector_store %arg8[%c0_79, %c0_80, %c0_81, %c0_82], %96 {strides = array<i32>} : memref<1x16x16x64xf32, #tpu.memory_space<vmem>>, vector<1x16x16x64xf32>,
    return
  }
  func.func @transform_0(%arg0: i32) -> (i32, i32, i32, i32) {
    %c0_i32 = arith.constant 0 : i32
    %c0_i32_0 = arith.constant 0 : i32
    %c0_i32_1 = arith.constant 0 : i32
    %c0_i32_2 = arith.constant 0 : i32
    return %arg0, %c0_i32, %c0_i32_0, %c0_i32_1 : i32, i32, i32, i32
  }
  func.func @transform_1(%arg0: i32) -> (i32, i32) {
    %c0_i32 = arith.constant 0 : i32
    %c0_i32_0 = arith.constant 0 : i32
    %c0_i32_1 = arith.constant 0 : i32
    return %c0_i32, %c0_i32_0 : i32, i32
  }
  func.func @transform_2(%arg0: i32) -> (i32, i32) {
    %c0_i32 = arith.constant 0 : i32
    %c0_i32_0 = arith.constant 0 : i32
    %c0_i32_1 = arith.constant 0 : i32
    return %c0_i32, %c0_i32_0 : i32, i32
  }
  func.func @transform_3(%arg0: i32) -> (i32, i32, i32) {
    %c0_i32 = arith.constant 0 : i32
    %c0_i32_0 = arith.constant 0 : i32
    %c0_i32_1 = arith.constant 0 : i32
    %c0_i32_2 = arith.constant 0 : i32
    return %c0_i32, %c0_i32_0, %c0_i32_1 : i32, i32, i32
  }
  func.func @transform_4(%arg0: i32) -> (i32, i32) {
    %c0_i32 = arith.constant 0 : i32
    %c0_i32_0 = arith.constant 0 : i32
    %c0_i32_1 = arith.constant 0 : i32
    return %c0_i32, %c0_i32_0 : i32, i32
  }
  func.func @transform_5(%arg0: i32) -> (i32, i32) {
    %c0_i32 = arith.constant 0 : i32
    %c0_i32_0 = arith.constant 0 : i32
    %c0_i32_1 = arith.constant 0 : i32
    return %c0_i32, %c0_i32_0 : i32, i32
  }
  func.func @transform_6(%arg0: i32) -> (i32, i32) {
    %c0_i32 = arith.constant 0 : i32
    %c0_i32_0 = arith.constant 0 : i32
    %c0_i32_1 = arith.constant 0 : i32
    return %c0_i32, %c0_i32_0 : i32, i32
  }
  func.func @transform_7(%arg0: i32) -> (i32, i32, i32, i32) {
    %c0_i32 = arith.constant 0 : i32
    %c0_i32_0 = arith.constant 0 : i32
    %c0_i32_1 = arith.constant 0 : i32
    %c0_i32_2 = arith.constant 0 : i32
    return %arg0, %c0_i32, %c0_i32_0, %c0_i32_1 : i32, i32, i32, i32
  }
}

</mosaic_0001>

<bundles_post_ra>
// kernel: tpu_custom_call.1
= control target key start
LH: loop header
LB: loop body
LE: loop exit
PB: predicated region body
PF: predicated region fallthrough
CT: control target
= control target key end

     0   :  { %s4911_s0 = inlined_call_operand.hbm [shape: bf16[2,16,16,64], index: 0, kind: input, shape index: {}]   ;;  %s4912_s1 = inlined_call_operand.vmem [shape: bf16[64,16], index: 1, kind: input, shape index: {}]   ;;  %s4913_s2 = inlined_call_operand.vmem [shape: f32[1,16], index: 2, kind: input, shape index: {}]   ;;  %s4914_s3 = inlined_call_operand.hbm [shape: bf16[9,16,16], index: 3, kind: input, shape index: {}]   ;;  %s4915_s4 = inlined_call_operand.vmem [shape: f32[1,16], index: 4, kind: input, shape index: {}]   ;;  %s4916_s5 = inlined_call_operand.vmem [shape: bf16[16,64], index: 5, kind: input, shape index: {}]   ;;  %s4917_s6 = inlined_call_operand.vmem [shape: f32[1,64], index: 6, kind: input, shape index: {}]   ;;  %s4918_s7 = inlined_call_operand.hbm [shape: f32[2,16,16,64], index: 7, kind: output, shape index: {}]  }
   0x1   :  { %4923 = sst [smem:[#allocation20_spill]] %s4914_s3 }
   0x2   :  { %12 = vsyncpa [#allocation4], 0 }
   0x3   :  { %14 = vsyncpa [#allocation4 + $0x1], 0 }
   0x4   :  { %15 = vsyncpa [#allocation7], 0 }
   0x5   :  { %16 = vsyncpa [#allocation5], 0 }
   0x6   :  { %18 = vsyncpa [#allocation5 + $0x1], 0  ;;  %s3761_s24 = smov 0   ;;  %s3763_s25 = smov 0  }
   0x7   :  { %s3765_s26 = smov 0   ;;  %s3767_s27 = smov 0  }
   0x8 LB: > { %s3782_s28 = sadd.s32 4294967295, %s3713_s27   ;;  %s3171_s29 = sadd.s32 4294967294, %s3713_s27   ;;  %s3713_s27 = sphi %s3767_s27, %s4952_s27   ;;  %s3709_s26 = sphi %s3765_s26, %s4951_s26   ;;  %s3705_s25 = sphi %s3763_s25, %s4950_s25   ;;  %s3701_s24 = sphi %s3761_s24, %s4949_s24  }
   0x9   : > { %p44_p0 = scmp.ne.s32.totalorder %s3705_s25, %s3701_s24  ;;  %p45_p1 = scmp.eq.s32.totalorder %s3782_s28, 0 }
   0xa   : > { %p194_p2 = scmp.eq.s32.totalorder %s3782_s28, 1  ;;  %p200_p3 = scmp.eq.s32.totalorder %s3171_s29, 1 }
   0xb   : > { %p3791_p4 = por %p45_p1, %p44_p0  ;;  %p3172_p5 = scmp.ge.s32.totalorder %s3713_s27, 1 }
   0xc   : > { %p3796_p6 = por %p200_p3, %p44_p0  ;;  %p207_p7 = scmp.lt.s32.totalorder %s3713_s27, 3 }
   0xd   : > { %s4926_s3 = sld [smem:[#allocation20_spill]]  ;;  %s3715_s13 = smov [#allocation6]  }
   0xe   : > { %p3804_p8 = pnand %p3172_p5, %p207_p7  ;;  %s226_s14 = sshll.u32 %s3715_s13, 4  ;;  %s227_s14 = int_to_ptr.vmem [resolvable:$true] %s226_s14 }
   0xf   : > { %s3814_s15 = sadd.s32 1, %s3713_s27   ;;  %s4919_s16 = smov 64  }
  0x10   : > { %p3526_p9 = pneg %p3804_p8  ;;  %s4920_s17 = smov 4  }
  0x11   : > { %s28_s18 = ssub.s32 %s3713_s27, %s3814_s15  ;;  %s31_s19 = sadd.s32 1, %s3709_s26 }
  0x12   : > { %p3527_p10 = pnand %p3526_p9, %p45_p1  ;;  %p29_p12 = scmp.eq.s32.totalorder %s28_s18, 0 }
  0x13   : > { %s224_s11 = sshll.u32 %s4926_s3, 4  ;;  %p38_p13 = scmp.ne.s32.totalorder %s3709_s26, %s3705_s25  ;;  %s225_s11 = int_to_ptr.hbm [resolvable:$true] %s224_s11 }
  0x14   : > { %3529 = dma.hbm_to_vmem [thread:$0]  (!%p3527_p10), %s225_s11, 1152, %s227_s14, [#allocation7], %s4919_s16, %s4919_s16, %s4920_s17  }
  0x15   : > { %p39_p0 = scmp.eq.s32.totalorder %s3713_s27, 0  ;;  %p3830_p3 = por %p194_p2, %p38_p13 }
  0x16   : > { %s3826_s20 = scalar_select %p29_p12, %s3709_s26, %s31_s19  }
  0x17   : > { %p3539_p5 = scmp.lt.s32.totalorder %s3713_s27, 2  ;;  %s249_s22 = sand.u32 1, %s3709_s26  }
  0x18   : > { %s3483_s23 = sshll.u32 %s3713_s27, 7  ;;  %p40_p7 = por %p39_p0, %p38_p13 }
  0x19   : > { %s3175_s29 = sshll.u32 %s249_s22, 7  ;;  %s258_s11 = scalar_lea.hbm %s4911_s0, %s3483_s23 }
  0x1a   : > { %s259_s13 = sshll.u32 %s258_s11, 4  ;;  %s253_s14 = scalar_lea.vmem [#allocation3], %s3175_s29  ;;  %s260_s13 = int_to_ptr.hbm [resolvable:$true] %s259_s13 }
  0x1b   : > { %s261_s18 = sshll.u32 %s253_s14, 4  ;;  %p3840_p9 = pnand %p3539_p5, %p40_p7  ;;  %s262_s18 = int_to_ptr.vmem [resolvable:$true] %s261_s18 }
  0x1c   : > { %s250_s16 = scalar_lea.sflag [#allocation4], %s249_s22  ;;  %s3613_s17 = sshra.s32 %s260_s13, 4  ;;  %s3614_s17 = int_to_ptr.hbm [resolvable:$true] %s3613_s17 }
  0x1d   : > { %s3615_s3 = scalar_lea.hbm %s3614_s17, 128  ;;  %p3617_p10 = pneg %p3840_p9 }
  0x1e   : > { %p3616_p2 = scmp.ne.s32.totalorder %s3614_s17, %s3615_s3  ;;  %s3620_s29 = scalar_lea.hbm %s4911_s0, 256 }
  0x1f   : > { %p3621_p0 = scmp.lt.s32.totalorder %s3614_s17, %s4911_s0  ;;  %p3622_p5 = scmp.lt.s32.totalorder %s3620_s29, %s3615_s3 }
  0x20   : > { %p3618_p12 = pnand %p3617_p10, %p3616_p2 }
  0x21   : > { %p3623_p7 = por %p3622_p5, %p3621_p0 }
  0x22   : > { %p3619_p13 = pneg %p3618_p12 }
  0x24   : > { %p3624_p11 = pnand %p3623_p7, %p3619_p13 }
  0x26   : > { %3627 = shalt.err (!%p3624_p11)
}
  0x27   : > { %s4930_s22 = smov 4   ;;  %s4931_s14 = smov 64  }
  0x28   : > { %3533 = dma.hbm_to_vmem [thread:$0]  (!%p3840_p9), %s260_s13, 2048, %s262_s18, %s250_s16, %s4931_s14, %s4931_s14, %s4930_s22  }
  0x29   : > { %273 = sbr.rel (%p3804_p8) target bundleno = 1251 (0x4e3), region = 48 }
  0x2e   : > { %s3860_s23 = sand.u32 1, %s3705_s25  }
  0x2f   : > { %s3179_s17 = sshll.u32 %s3860_s23, 7  ;;  %s276_s3 = scalar_lea.sflag [#allocation4], %s3860_s23 }
  0x30   : > { %s3864_s9 = scalar_lea.vmem [#allocation3], %s3179_s17 }
  0x31   : > { %3688 = dma.done.wait (%p3791_p4), %s276_s3, 2048  }
  0x32   : > { %3690 = vsyncadd (%p3791_p4), %s276_s3, 4294965248 }
  0x33   : > { %3692 = dma.done.wait (%p45_p1), [#allocation7], 1152  }
  0x34   : > { %3694 = vsyncadd (%p45_p1), [#allocation7], 4294966144  ;;  %v3503_v0 = vld [vmem:[%s4912_s1 + $0x18] sm:$0xff]  ;;  %v3502_v1 = vld [vmem:[%s4912_s1 + $0x10] sm:$0xff]  ;;  %vm465_vm0 = vcmask 523264   ;;  %vm635_vm1 = vcmask 130048  }
  0x35   : > { %518 = vmatpush.bf16.msra.mxu0 %v3503_v0  ;;  %v3501_v2 = vld [vmem:[%s4912_s1 + $0x8] sm:$0xff]  ;;  %v3500_v3 = vld [vmem:[%s4912_s1] sm:$0xff]  ;;  %v3486_v6 = vld [vmem:[%s3864_s9 + $0x10] sm:$0xff]  ;;  %v3718_v11 = vmov 0.0   ;;  %s3181_s18 = sshll.u32 %s3860_s23, 8  ;;  %s3514_s19 = sshll.u32 %s3782_s28, 8 }
  0x36   : > { %v3484_v4 = vld [vmem:[%s3864_s9] sm:$0xff]  ;;  %v3485_v5 = vld [vmem:[%s3864_s9 + $0x8] sm:$0xff]  ;;  %v3487_v7 = vld [vmem:[%s3864_s9 + $0x18] sm:$0xff]  ;;  %641 = vst.msk [vmem:[#allocation2 + $0x28] sm:$0xff] %vm635_vm1, %v3718_v11  ;;  %s4727_s30 = scalar_lea.vmem [#allocation8], %s3181_s18  ;;  %s3084_s11 = scalar_lea.hbm %s4918_s7, %s3514_s19 }
  0x37   : > { %v3488_v8 = vld [vmem:[%s3864_s9 + $0x20] sm:$0xff]  ;;  %v3489_v9 = vld [vmem:[%s3864_s9 + $0x28] sm:$0xff]  ;;  %v3490_v10 = vld [vmem:[%s3864_s9 + $0x30] sm:$0xff]  ;;  %636 = vst.msk [vmem:[#allocation2] sm:$0xff] %vm635_vm1, %v3718_v11  ;;  %s3087_s22 = sshll.u32 %s3084_s11, 4  ;;  %s3073_s28 = scalar_lea.sflag [#allocation5], %s3860_s23  ;;  %s3088_s22 = int_to_ptr.hbm [resolvable:$true] %s3087_s22 }
  0x38   : > { %637 = vst.msk [vmem:[#allocation2 + $0x8] sm:$0xff] %vm635_vm1, %v3718_v11  ;;  %v3491_v12 = vld [vmem:[%s3864_s9 + $0x38] sm:$0xff]  ;;  %v3955_v13 = vld [vmem:[%s4913_s2] ss:$0 sm:$0xff]  ;;  %v3493_v19 = vld [vmem:[%s3864_s9 + $0x48] sm:$0xff]  ;;  %s3657_s14 = sshra.s32 %s3088_s22, 4  ;;  %s3658_s14 = int_to_ptr.hbm [resolvable:$true] %s3657_s14 }
  0x39   : > { %519 = vmatpush.bf16.msra.mxu0 %v3502_v1  ;;  %638 = vst.msk [vmem:[#allocation2 + $0x10] sm:$0xff] %vm635_vm1, %v3718_v11  ;;  %v3492_v14 = vld [vmem:[%s3864_s9 + $0x40] sm:$0xff]  ;;  %v3505_v21 = vld [vmem:[#allocation6 + $0x8] sm:$0xff]  ;;  %v4013_v23 = vld [vmem:[#allocation6 + $0x10] sm:$0xff]  ;;  %s3659_s17 = scalar_lea.hbm %s3658_s14, 256  ;;  %s3663_s16 = scalar_lea.hbm %s4918_s7, 512 }
  0x3a   : > { %639 = vst.msk [vmem:[#allocation2 + $0x18] sm:$0xff] %vm635_vm1, %v3718_v11  ;;  %v3504_v22 = vld [vmem:[#allocation6] sm:$0xff]  ;;  %3515 = vmatpush.bf16.msra.mxu1 %v3505_v21  ;;  %3517 = vmatpush.bf16.msra.mxu3 %v4013_v23  ;;  %v3507_v26 = vld [vmem:[#allocation6 + $0x18] sm:$0xff]  ;;  %v3494_v27 = vld [vmem:[%s3864_s9 + $0x50] sm:$0xff]  ;;  %p3660_p1 = scmp.ne.s32.totalorder %s3658_s14, %s3659_s17  ;;  %p3664_p11 = scmp.lt.s32.totalorder %s3658_s14, %s4918_s7 }
  0x3b   : > { %640 = vst.msk [vmem:[#allocation2 + $0x20] sm:$0xff] %vm635_vm1, %v3718_v11  ;;  %3516 = vmatpush.bf16.msra.mxu2 %v3504_v22  ;;  %v3508_v25 = vld [vmem:[#allocation6 + $0x20] sm:$0xff]  ;;  %v3495_v40 = vld [vmem:[%s3864_s9 + $0x58] sm:$0xff]  ;;  %p3665_p9 = scmp.lt.s32.totalorder %s3663_s16, %s3659_s17 }
  0x3c   : > { %642 = vst.msk [vmem:[#allocation2 + $0x30] sm:$0xff] %vm635_vm1, %v3718_v11  ;;  %v3496_v56 = vld [vmem:[%s3864_s9 + $0x60] sm:$0xff]  ;;  %p3661_p4 = pnand %p3660_p1, %p3830_p3 }
  0x3d   : > { %520 = vmatpush.bf16.msra.mxu0 %v3501_v2  ;;  %643 = vst.msk [vmem:[#allocation2 + $0x38] sm:$0xff] %vm635_vm1, %v3718_v11  ;;  %p3666_p2 = por %p3665_p9, %p3664_p11 }
  0x3e   : > { %644 = vst.msk [vmem:[#allocation2 + $0x40] sm:$0xff] %vm635_vm1, %v3718_v11  ;;  %1466 = vmatpush.bf16.msrb.mxu1 %v3507_v26  ;;  %v3498_v26 = vld [vmem:[%s3864_s9 + $0x70] sm:$0xff]  ;;  %p3662_p8 = pneg %p3661_p4 }
  0x3f   : > { %645 = vst.msk [vmem:[#allocation2 + $0x48] sm:$0xff] %vm635_vm1, %v3718_v11  ;;  %1692 = vmatpush.bf16.msrb.mxu2 %v3508_v25 }
  0x40   : > { %646 = vst.msk [vmem:[#allocation2 + $0x50] sm:$0xff] %vm635_vm1, %v3718_v11  ;;  %p3667_p10 = pnand %p3666_p2, %p3662_p8 }
  0x41   : > { %521 = vmatpush.bf16.msra.mxu0 %v3500_v3  ;;  %647 = vst.msk [vmem:[#allocation2 + $0x58] sm:$0xff] %vm635_vm1, %v3718_v11 }
  0x42   : > { %648 = vst.msk [vmem:[#allocation2 + $0x60] sm:$0xff] %vm635_vm1, %v3718_v11 }
  0x43   : > { %649 = vst.msk [vmem:[#allocation2 + $0x68] sm:$0xff] %vm635_vm1, %v3718_v11 }
  0x44   : > { %3262 = vmatmul.msk.bf16.vlgmr.msra.gmra.mxu0 %vm465_vm0, %v3484_v4  ;;  %650 = vst.msk [vmem:[#allocation2 + $0x70] sm:$0xff] %vm635_vm1, %v3718_v11 }
  0x45   : > { %651 = vst.msk [vmem:[#allocation2 + $0x78] sm:$0xff] %vm635_vm1, %v3718_v11  ;;  %903 = vmatpush.bf16.msrb.mxu0 %v3505_v21 }
  0x46   : > { %652 = vst.msk [vmem:[#allocation2 + $0x80] sm:$0xff] %vm635_vm1, %v3718_v11 }
  0x47   : > { %653 = vst.msk [vmem:[#allocation2 + $0x88] sm:$0xff] %vm635_vm1, %v3718_v11 }
  0x48   : > { %654 = vst.msk [vmem:[#allocation2 + $0x90] sm:$0xff] %vm635_vm1, %v3718_v11 }
  0x49   : > { %655 = vst.msk [vmem:[#allocation2 + $0x98] sm:$0xff] %vm635_vm1, %v3718_v11  ;;  %1046 = vmatpush.bf16.msra.mxu0 %v3504_v22 }
  0x4a   : > { %656 = vst.msk [vmem:[#allocation2 + $0xa0] sm:$0xff] %vm635_vm1, %v3718_v11 }
  0x4b   : > { %657 = vst.msk [vmem:[#allocation2 + $0xa8] sm:$0xff] %vm635_vm1, %v3718_v11 }
  0x4c   : > { %658 = vst.msk [vmem:[#allocation2 + $0xb0] sm:$0xff] %vm635_vm1, %v3718_v11 }
  0x4d   : > { %659 = vst.msk [vmem:[#allocation2 + $0xb8] sm:$0xff] %vm635_vm1, %v3718_v11 }
  0x4e   : > { %660 = vst.msk [vmem:[#allocation2 + $0xc0] sm:$0xff] %vm635_vm1, %v3718_v11 }
  0x4f   : > { %661 = vst.msk [vmem:[#allocation2 + $0xc8] sm:$0xff] %vm635_vm1, %v3718_v11 }
  0x50   : > { %662 = vst.msk [vmem:[#allocation2 + $0xd0] sm:$0xff] %vm635_vm1, %v3718_v11 }
  0x51   : > { %663 = vst.msk [vmem:[#allocation2 + $0xd8] sm:$0xff] %vm635_vm1, %v3718_v11 }
  0x52   : > { %664 = vst.msk [vmem:[#allocation2 + $0xe0] sm:$0xff] %vm635_vm1, %v3718_v11 }
  0x53   : > { %665 = vst.msk [vmem:[#allocation2 + $0xe8] sm:$0xff] %vm635_vm1, %v3718_v11 }
  0x54   : > { %3263 = vmatmul.msk.bf16.gmra.mxu0 %vm465_vm0, %v3485_v5  ;;  %666 = vst.msk [vmem:[#allocation2 + $0xf0] sm:$0xff] %vm635_vm1, %v3718_v11 }
  0x55   : > { %667 = vst.msk [vmem:[#allocation2 + $0xf8] sm:$0xff] %vm635_vm1, %v3718_v11 }
  0x56   : > { %668 = vst.msk [vmem:[#allocation2 + $0x100] sm:$0xff] %vm635_vm1, %v3718_v11 }
  0x57   : > { %669 = vst.msk [vmem:[#allocation2 + $0x108] sm:$0xff] %vm635_vm1, %v3718_v11 }
  0x58   : > { %670 = vst.msk [vmem:[#allocation2 + $0x110] sm:$0xff] %vm635_vm1, %v3718_v11 }
  0x59   : > { %671 = vst.msk [vmem:[#allocation2 + $0x118] sm:$0xff] %vm635_vm1, %v3718_v11 }
  0x5a   : > { %672 = vst.msk [vmem:[#allocation2 + $0x120] sm:$0xff] %vm635_vm1, %v3718_v11 }
  0x5b   : > { %673 = vst.msk [vmem:[#allocation2 + $0x128] sm:$0xff] %vm635_vm1, %v3718_v11 }
  0x5c   : > { %674 = vst.msk [vmem:[#allocation2 + $0x130] sm:$0xff] %vm635_vm1, %v3718_v11 }
  0x5d   : > { %675 = vst.msk [vmem:[#allocation2 + $0x138] sm:$0xff] %vm635_vm1, %v3718_v11 }
  0x5e   : > { %676 = vst.msk [vmem:[#allocation2 + $0x140] sm:$0xff] %vm635_vm1, %v3718_v11 }
  0x5f   : > { %677 = vst.msk [vmem:[#allocation2 + $0x148] sm:$0xff] %vm635_vm1, %v3718_v11 }
  0x60   : > { %678 = vst.msk [vmem:[#allocation2 + $0x150] sm:$0xff] %vm635_vm1, %v3718_v11 }
  0x61   : > { %679 = vst.msk [vmem:[#allocation2 + $0x158] sm:$0xff] %vm635_vm1, %v3718_v11 }
  0x62   : > { %680 = vst.msk [vmem:[#allocation2 + $0x160] sm:$0xff] %vm635_vm1, %v3718_v11 }
  0x63   : > { %681 = vst.msk [vmem:[#allocation2 + $0x168] sm:$0xff] %vm635_vm1, %v3718_v11 }
  0x64   : > { %3264 = vmatmul.msk.bf16.gmra.mxu0 %vm465_vm0, %v3486_v6  ;;  %682 = vst.msk [vmem:[#allocation2 + $0x170] sm:$0xff] %vm635_vm1, %v3718_v11 }
  0x65   : > { %683 = vst.msk [vmem:[#allocation2 + $0x178] sm:$0xff] %vm635_vm1, %v3718_v11 }
  0x66   : > { %684 = vst.msk [vmem:[#allocation2 + $0x180] sm:$0xff] %vm635_vm1, %v3718_v11 }
  0x67   : > { %685 = vst.msk [vmem:[#allocation2 + $0x188] sm:$0xff] %vm635_vm1, %v3718_v11 }
  0x68   : > { %686 = vst.msk [vmem:[#allocation2 + $0x190] sm:$0xff] %vm635_vm1, %v3718_v11 }
  0x69   : > { %687 = vst.msk [vmem:[#allocation2 + $0x198] sm:$0xff] %vm635_vm1, %v3718_v11 }
  0x6a   : > { %688 = vst.msk [vmem:[#allocation2 + $0x1a0] sm:$0xff] %vm635_vm1, %v3718_v11 }
  0x6b   : > { %689 = vst.msk [vmem:[#allocation2 + $0x1a8] sm:$0xff] %vm635_vm1, %v3718_v11 }
  0x6c   : > { %690 = vst.msk [vmem:[#allocation2 + $0x1b0] sm:$0xff] %vm635_vm1, %v3718_v11 }
  0x6d   : > { %691 = vst.msk [vmem:[#allocation2 + $0x1b8] sm:$0xff] %vm635_vm1, %v3718_v11 }
  0x6e   : > { %692 = vst.msk [vmem:[#allocation2 + $0x1c0] sm:$0xff] %vm635_vm1, %v3718_v11 }
  0x6f   : > { %693 = vst.msk [vmem:[#allocation2 + $0x1c8] sm:$0xff] %vm635_vm1, %v3718_v11 }
  0x70   : > { %694 = vst.msk [vmem:[#allocation2 + $0x1d0] sm:$0xff] %vm635_vm1, %v3718_v11 }
  0x71   : > { %695 = vst.msk [vmem:[#allocation2 + $0x1d8] sm:$0xff] %vm635_vm1, %v3718_v11 }
  0x72   : > { %696 = vst.msk [vmem:[#allocation2 + $0x1e0] sm:$0xff] %vm635_vm1, %v3718_v11 }
  0x73   : > { %697 = vst.msk [vmem:[#allocation2 + $0x1e8] sm:$0xff] %vm635_vm1, %v3718_v11 }
  0x74   : > { %3265 = vmatmul.msk.bf16.gmra.mxu0 %vm465_vm0, %v3487_v7  ;;  %698 = vst.msk [vmem:[#allocation2 + $0x1f0] sm:$0xff] %vm635_vm1, %v3718_v11 }
  0x75   : > { %699 = vst.msk [vmem:[#allocation2 + $0x1f8] sm:$0xff] %vm635_vm1, %v3718_v11 }
  0x76   : > { %700 = vst.msk [vmem:[#allocation2 + $0x200] sm:$0xff] %vm635_vm1, %v3718_v11 }
  0x77   : > { %701 = vst.msk [vmem:[#allocation2 + $0x208] sm:$0xff] %vm635_vm1, %v3718_v11 }
  0x78   : > { %702 = vst.msk [vmem:[#allocation2 + $0x210] sm:$0xff] %vm635_vm1, %v3718_v11 }
  0x79   : > { %703 = vst.msk [vmem:[#allocation2 + $0x218] sm:$0xff] %vm635_vm1, %v3718_v11 }
  0x7a   : > { %704 = vst.msk [vmem:[#allocation2 + $0x220] sm:$0xff] %vm635_vm1, %v3718_v11 }
  0x7b   : > { %705 = vst.msk [vmem:[#allocation2 + $0x228] sm:$0xff] %vm635_vm1, %v3718_v11 }
  0x7c   : > { %706 = vst.msk [vmem:[#allocation2 + $0x230] sm:$0xff] %vm635_vm1, %v3718_v11 }
  0x7d   : > { %707 = vst.msk [vmem:[#allocation2 + $0x238] sm:$0xff] %vm635_vm1, %v3718_v11 }
  0x84   : > { %3266 = vmatmul.msk.bf16.gmra.mxu0 %vm465_vm0, %v3488_v8  ;;  %v3497_v8 = vld [vmem:[%s3864_s9 + $0x68] sm:$0xff] }
  0x94   : > { %3267 = vmatmul.msk.bf16.gmra.mxu0 %vm465_vm0, %v3489_v9 }
  0xa4   : > { %3268 = vmatmul.msk.bf16.gmra.mxu0 %vm465_vm0, %v3490_v10 }
  0xb4   : > { %3269 = vmatmul.msk.bf16.gmra.mxu0 %vm465_vm0, %v3491_v12 }
  0xc1   : > { %v523_v15 = vpop.f32.mrf.mxu0 }
  0xc2   : > { %v524_v16 = vadd.f32 %v3955_v13, %v523_v15 }
  0xc4   : > { %v603_v17 = vmax.f32 %v524_v16, 0.0  ;;  %3270 = vmatmul.msk.bf16.gmra.mxu0 %vm465_vm0, %v3492_v14 }
  0xc6   : > { %709 = vst.msk [vmem:[#allocation2 + $0x28] sm:$0xff] %vm635_vm1, %v603_v17 }
  0xc9   : > { %v525_v18 = vpop.f32.mrf.mxu0 }
  0xca   : > { %v526_v29 = vadd.f32 %v3955_v13, %v525_v18 }
  0xcc   : > { %v604_v34 = vmax.f32 %v526_v29, 0.0 }
  0xce   : > { %710 = vst.msk [vmem:[#allocation2 + $0x30] sm:$0xff] %vm635_vm1, %v604_v34 }
  0xd1   : > { %v528_v20 = vpop.f32.mrf.mxu0 }
  0xd2   : > { %v529_v30 = vadd.f32 %v3955_v13, %v528_v20 }
  0xd4   : > { %3271 = vmatmul.msk.bf16.gmra.mxu0 %vm465_vm0, %v3493_v19  ;;  %v605_v36 = vmax.f32 %v529_v30, 0.0 }
  0xd6   : > { %711 = vst.msk [vmem:[#allocation2 + $0x48] sm:$0xff] %vm635_vm1, %v605_v36 }
  0xd9   : > { %v530_v24 = vpop.f32.mrf.mxu0 }
  0xda   : > { %v531_v31 = vadd.f32 %v3955_v13, %v530_v24 }
  0xdc   : > { %v606_v37 = vmax.f32 %v531_v31, 0.0 }
  0xde   : > { %712 = vst.msk [vmem:[#allocation2 + $0x50] sm:$0xff] %vm635_vm1, %v606_v37 }
  0xe1   : > { %v533_v28 = vpop.f32.mrf.mxu0 }
  0xe2   : > { %v534_v32 = vadd.f32 %v3955_v13, %v533_v28 }
  0xe4   : > { %3272 = vmatmul.msk.bf16.gmra.mxu0 %vm465_vm0, %v3494_v27  ;;  %v607_v38 = vmax.f32 %v534_v32, 0.0 }
  0xe6   : > { %713 = vst.msk [vmem:[#allocation2 + $0x68] sm:$0xff] %vm635_vm1, %v607_v38 }
  0xe9   : > { %v535_v33 = vpop.f32.mrf.mxu0 }
  0xea   : > { %v536_v35 = vadd.f32 %v3955_v13, %v535_v33 }
  0xec   : > { %v608_v39 = vmax.f32 %v536_v35, 0.0 }
  0xed   : > { %v797_v44 = vld [vmem:[#allocation2 + $0x68] sm:$0xff] }
  0xee   : > { %714 = vst.msk [vmem:[#allocation2 + $0x70] sm:$0xff] %vm635_vm1, %v608_v39  ;;  %v747_v45 = vld [vmem:[#allocation2 + $0x67] sm:$0xff] }
  0xf1   : > { %v538_v41 = vpop.f32.mrf.mxu0 }
  0xf2   : > { %v539_v42 = vadd.f32 %v3955_v13, %v538_v41 }
  0xf4   : > { %v609_v43 = vmax.f32 %v539_v42, 0.0  ;;  %3273 = vmatmul.msk.bf16.gmra.mxu0 %vm465_vm0, %v3495_v40  ;;  %v3499_v42 = vld [vmem:[%s3864_s9 + $0x78] sm:$0xff] }
  0xf5   : > { %v798_v46 = vld [vmem:[#allocation2 + $0x70] sm:$0xff] }
  0xf6   : > { %715 = vst.msk [vmem:[#allocation2 + $0x88] sm:$0xff] %vm635_vm1, %v609_v43  ;;  %v748_v47 = vld [vmem:[#allocation2 + $0x6f] sm:$0xff]  ;;  %v4076_v50 = vpack.c.bf16 %v798_v46, %v797_v44 }
  0xf7   : > { %v1134_v48 = vld [vmem:[#allocation2 + $0x69] sm:$0xff]  ;;  %v4078_v51 = vpack.c.bf16 %v748_v47, %v747_v45  ;;  %v1135_v52 = vld [vmem:[#allocation2 + $0x71] sm:$0xff] }
  0xf8   : > { %v4081_v54 = vpack.c.bf16 %v1135_v52, %v1134_v48  ;;  %3285 = vmatmul.msk.bf16.vlgmr.msra.gmra.mxu1 %vm635_vm1, %v4076_v50 }
  0xf9   : > { %v540_v49 = vpop.f32.mrf.mxu0  ;;  %3305 = vmatmul.msk.bf16.vlgmr.msra.gmra.mxu2 %vm635_vm1, %v4078_v51 }
  0xfa   : > { %v541_v53 = vadd.f32 %v3955_v13, %v540_v49  ;;  %3325 = vmatmul.msk.bf16.vlgmr.msra.gmra.mxu3 %vm635_vm1, %v4081_v54 }
  0xfc   : > { %v610_v55 = vmax.f32 %v541_v53, 0.0 }
  0xfd   : > { %v799_v0 = vld [vmem:[#allocation2 + $0x88] sm:$0xff] }
  0xfe   : > { %716 = vst.msk [vmem:[#allocation2 + $0x90] sm:$0xff] %vm635_vm1, %v610_v55  ;;  %v749_v1 = vld [vmem:[#allocation2 + $0x87] sm:$0xff] }
 0x101   : > { %v543_v57 = vpop.f32.mrf.mxu0 }
 0x102   : > { %v544_v58 = vadd.f32 %v3955_v13, %v543_v57 }
 0x104   : > { %v611_v59 = vmax.f32 %v544_v58, 0.0  ;;  %3274 = vmatmul.msk.bf16.gmra.mxu0 %vm465_vm0, %v3496_v56 }
 0x105   : > { %v800_v60 = vld [vmem:[#allocation2 + $0x90] sm:$0xff] }
 0x106   : > { %v750_v61 = vld [vmem:[#allocation2 + $0x8f] sm:$0xff]  ;;  %717 = vst.msk [vmem:[#allocation2 + $0xa8] sm:$0xff] %vm635_vm1, %v611_v59  ;;  %v4094_v2 = vpack.c.bf16 %v800_v60, %v799_v0 }
 0x107   : > { %v1136_v62 = vld [vmem:[#allocation2 + $0x89] sm:$0xff]  ;;  %v1137_v63 = vld [vmem:[#allocation2 + $0x91] sm:$0xff]  ;;  %v4096_v3 = vpack.c.bf16 %v750_v61, %v749_v1 }
 0x108   : > { %v4098_v4 = vpack.c.bf16 %v1137_v63, %v1136_v62  ;;  %3286 = vmatmul.msk.bf16.gmra.mxu1 %vm635_vm1, %v4094_v2  ;;  %v791_v61 = vld [vmem:[#allocation2 + $0x8] sm:$0xff]  ;;  %v792_v62 = vld [vmem:[#allocation2 + $0x10] sm:$0xff] }
 0x109   : > { %v545_v5 = vpop.f32.mrf.mxu0  ;;  %3306 = vmatmul.msk.bf16.gmra.mxu2 %vm635_vm1, %v4096_v3  ;;  %v823_v63 = vpack.c.bf16 %v792_v62, %v791_v61 }
 0x10a   : > { %v546_v6 = vadd.f32 %v3955_v13, %v545_v5  ;;  %3326 = vmatmul.msk.bf16.gmra.mxu3 %vm635_vm1, %v4098_v4 }
 0x10c   : > { %v612_v7 = vmax.f32 %v546_v6, 0.0 }
 0x10d   : > { %v801_v17 = vld [vmem:[#allocation2 + $0xa8] sm:$0xff] }
 0x10e   : > { %718 = vst.msk [vmem:[#allocation2 + $0xb0] sm:$0xff] %vm635_vm1, %v612_v7  ;;  %v751_v18 = vld [vmem:[#allocation2 + $0xa7] sm:$0xff] }
 0x111   : > { %v548_v9 = vpop.f32.mrf.mxu0 }
 0x112   : > { %v549_v10 = vadd.f32 %v3955_v13, %v548_v9 }
 0x114   : > { %v613_v11 = vmax.f32 %v549_v10, 0.0  ;;  %3275 = vmatmul.msk.bf16.gmra.mxu0 %vm465_vm0, %v3497_v8 }
 0x115   : > { %v802_v12 = vld [vmem:[#allocation2 + $0xb0] sm:$0xff] }
 0x116   : > { %v752_v14 = vld [vmem:[#allocation2 + $0xaf] sm:$0xff]  ;;  %719 = vst.msk [vmem:[#allocation2 + $0xc8] sm:$0xff] %vm635_vm1, %v613_v11  ;;  %v4112_v19 = vpack.c.bf16 %v802_v12, %v801_v17 }
 0x117   : > { %v1138_v15 = vld [vmem:[#allocation2 + $0xa9] sm:$0xff]  ;;  %v1139_v16 = vld [vmem:[#allocation2 + $0xb1] sm:$0xff]  ;;  %v4114_v20 = vpack.c.bf16 %v752_v14, %v751_v18 }
 0x118   : > { %v4116_v21 = vpack.c.bf16 %v1139_v16, %v1138_v15  ;;  %3287 = vmatmul.msk.bf16.gmra.mxu1 %vm635_vm1, %v4112_v19  ;;  %v794_v18 = vld [vmem:[#allocation2 + $0x30] sm:$0xff] }
 0x119   : > { %v550_v22 = vpop.f32.mrf.mxu0  ;;  %3307 = vmatmul.msk.bf16.gmra.mxu2 %vm635_vm1, %v4114_v20 }
 0x11a   : > { %v551_v24 = vadd.f32 %v3955_v13, %v550_v22  ;;  %3327 = vmatmul.msk.bf16.gmra.mxu3 %vm635_vm1, %v4116_v21 }
 0x11c   : > { %v614_v25 = vmax.f32 %v551_v24, 0.0  ;;  %v793_v24 = vld [vmem:[#allocation2 + $0x28] sm:$0xff] }
 0x11d   : > { %v803_v34 = vld [vmem:[#allocation2 + $0xc8] sm:$0xff] }
 0x11e   : > { %720 = vst.msk [vmem:[#allocation2 + $0xd0] sm:$0xff] %vm635_vm1, %v614_v25  ;;  %v753_v35 = vld [vmem:[#allocation2 + $0xc7] sm:$0xff] }
 0x121   : > { %v553_v27 = vpop.f32.mrf.mxu0 }
 0x122   : > { %v554_v28 = vadd.f32 %v3955_v13, %v553_v27 }
 0x124   : > { %v615_v29 = vmax.f32 %v554_v28, 0.0  ;;  %3276 = vmatmul.msk.bf16.gmra.mxu0 %vm465_vm0, %v3498_v26  ;;  %v4181_v26 = vpack.c.bf16 %v794_v18, %v793_v24 }
 0x125   : > { %v804_v30 = vld [vmem:[#allocation2 + $0xd0] sm:$0xff] }
 0x126   : > { %v754_v31 = vld [vmem:[#allocation2 + $0xcf] sm:$0xff]  ;;  %721 = vst.msk [vmem:[#allocation2 + $0xe8] sm:$0xff] %vm635_vm1, %v615_v29  ;;  %v4130_v36 = vpack.c.bf16 %v804_v30, %v803_v34 }
 0x127   : > { %v1140_v32 = vld [vmem:[#allocation2 + $0xc9] sm:$0xff]  ;;  %v1141_v33 = vld [vmem:[#allocation2 + $0xd1] sm:$0xff]  ;;  %v4132_v37 = vpack.c.bf16 %v754_v31, %v753_v35 }
 0x128   : > { %v4134_v38 = vpack.c.bf16 %v1141_v33, %v1140_v32  ;;  %3288 = vmatmul.msk.bf16.gmra.mxu1 %vm635_vm1, %v4130_v36 }
 0x129   : > { %v555_v39 = vpop.f32.mrf.mxu0  ;;  %3308 = vmatmul.msk.bf16.gmra.mxu2 %vm635_vm1, %v4132_v37 }
 0x12a   : > { %v556_v40 = vadd.f32 %v3955_v13, %v555_v39  ;;  %3328 = vmatmul.msk.bf16.gmra.mxu3 %vm635_vm1, %v4134_v38 }
 0x12c   : > { %v616_v41 = vmax.f32 %v556_v40, 0.0 }
 0x12d   : > { %v805_v52 = vld [vmem:[#allocation2 + $0xe8] sm:$0xff] }
 0x12e   : > { %722 = vst.msk [vmem:[#allocation2 + $0xf0] sm:$0xff] %vm635_vm1, %v616_v41  ;;  %v755_v53 = vld [vmem:[#allocation2 + $0xe7] sm:$0xff] }
 0x131   : > { %v558_v43 = vpop.f32.mrf.mxu0 }
 0x132   : > { %v559_v44 = vadd.f32 %v3955_v13, %v558_v43  ;;  %v796_v43 = vld [vmem:[#allocation2 + $0x50] sm:$0xff] }
 0x134   : > { %v617_v45 = vmax.f32 %v559_v44, 0.0  ;;  %3277 = vmatmul.msk.bf16.gmra.mxu0 %vm465_vm0, %v3499_v42 }
 0x135   : > { %v806_v46 = vld [vmem:[#allocation2 + $0xf0] sm:$0xff] }
 0x136   : > { %v756_v47 = vld [vmem:[#allocation2 + $0xef] sm:$0xff]  ;;  %723 = vst.msk [vmem:[#allocation2 + $0x108] sm:$0xff] %vm635_vm1, %v617_v45  ;;  %v4148_v55 = vpack.c.bf16 %v806_v46, %v805_v52 }
 0x137   : > { %v1142_v48 = vld [vmem:[#allocation2 + $0xe9] sm:$0xff]  ;;  %v1143_v49 = vld [vmem:[#allocation2 + $0xf1] sm:$0xff]  ;;  %v4150_v56 = vpack.c.bf16 %v756_v47, %v755_v53 }
 0x138   : > { %v4152_v57 = vpack.c.bf16 %v1143_v49, %v1142_v48  ;;  %3289 = vmatmul.msk.bf16.gmra.mxu1 %vm635_vm1, %v4148_v55  ;;  %v795_v45 = vld [vmem:[#allocation2 + $0x48] sm:$0xff] }
 0x139   : > { %v560_v58 = vpop.f32.mrf.mxu0  ;;  %3309 = vmatmul.msk.bf16.gmra.mxu2 %vm635_vm1, %v4150_v56  ;;  %v4201_v47 = vpack.c.bf16 %v796_v43, %v795_v45 }
 0x13a   : > { %v561_v59 = vadd.f32 %v3955_v13, %v560_v58  ;;  %3329 = vmatmul.msk.bf16.gmra.mxu3 %vm635_vm1, %v4152_v57 }
 0x13c   : > { %v618_v60 = vmax.f32 %v561_v59, 0.0 }
 0x13d   : > { %v807_v10 = vld [vmem:[#allocation2 + $0x108] sm:$0xff] }
 0x13e   : > { %724 = vst.msk [vmem:[#allocation2 + $0x110] sm:$0xff] %vm635_vm1, %v618_v60  ;;  %v757_v11 = vld [vmem:[#allocation2 + $0x107] sm:$0xff] }
 0x141   : > { %v563_v0 = vpop.f32.mrf.mxu0 }
 0x142   : > { %v564_v1 = vadd.f32 %v3955_v13, %v563_v0 }
 0x144   : > { %v619_v5 = vmax.f32 %v564_v1, 0.0  ;;  %3282 = vmatmul.msk.bf16.vlgmr.msrb.gmra.mxu0 %vm635_vm1, %v823_v63 }
 0x145   : > { %v808_v6 = vld [vmem:[#allocation2 + $0x110] sm:$0xff]  ;;  %1240 = vmatpush.bf16.msrb.mxu0 %v4013_v23 }
 0x146   : > { %v758_v7 = vld [vmem:[#allocation2 + $0x10f] sm:$0xff]  ;;  %725 = vst.msk [vmem:[#allocation2 + $0x128] sm:$0xff] %vm635_vm1, %v619_v5  ;;  %v4166_v12 = vpack.c.bf16 %v808_v6, %v807_v10  ;;  %v741_v6 = vld [vmem:[#allocation2 + $0x7] sm:$0xff] }
 0x147   : > { %v1144_v8 = vld [vmem:[#allocation2 + $0x109] sm:$0xff]  ;;  %v1145_v9 = vld [vmem:[#allocation2 + $0x111] sm:$0xff]  ;;  %v4168_v14 = vpack.c.bf16 %v758_v7, %v757_v11 }
 0x148   : > { %v4170_v15 = vpack.c.bf16 %v1145_v9, %v1144_v8  ;;  %3290 = vmatmul.msk.bf16.gmra.mxu1 %vm635_vm1, %v4166_v12  ;;  %v742_v7 = vld [vmem:[#allocation2 + $0xf] sm:$0xff] }
 0x149   : > { %v565_v16 = vpop.f32.mrf.mxu0  ;;  %3310 = vmatmul.msk.bf16.gmra.mxu2 %vm635_vm1, %v4168_v14  ;;  %v773_v8 = vpack.c.bf16 %v742_v7, %v741_v6  ;;  %v3509_v11 = vld [vmem:[#allocation6 + $0x28] sm:$0xff] }
 0x14a   : > { %v566_v17 = vadd.f32 %v3955_v13, %v565_v16  ;;  %3330 = vmatmul.msk.bf16.gmra.mxu3 %vm635_vm1, %v4170_v15 }
 0x14b   : > { %1918 = vmatpush.bf16.msrb.mxu3 %v3509_v11 }
 0x14c   : > { %v620_v23 = vmax.f32 %v566_v17, 0.0 }
 0x14d   : > { %v809_v32 = vld [vmem:[#allocation2 + $0x128] sm:$0xff] }
 0x14e   : > { %726 = vst.msk [vmem:[#allocation2 + $0x130] sm:$0xff] %vm635_vm1, %v620_v23  ;;  %v759_v33 = vld [vmem:[#allocation2 + $0x127] sm:$0xff] }
 0x151   : > { %v568_v22 = vpop.f32.mrf.mxu0 }
 0x152   : > { %v569_v25 = vadd.f32 %v3955_v13, %v568_v22 }
 0x154   : > { %v621_v27 = vmax.f32 %v569_v25, 0.0  ;;  %3283 = vmatmul.msk.bf16.gmra.mxu0 %vm635_vm1, %v4181_v26 }
 0x155   : > { %v810_v28 = vld [vmem:[#allocation2 + $0x130] sm:$0xff] }
 0x156   : > { %v760_v29 = vld [vmem:[#allocation2 + $0x12f] sm:$0xff]  ;;  %727 = vst.msk [vmem:[#allocation2 + $0x148] sm:$0xff] %vm635_vm1, %v621_v27  ;;  %v4186_v34 = vpack.c.bf16 %v810_v28, %v809_v32 }
 0x157   : > { %v1146_v30 = vld [vmem:[#allocation2 + $0x129] sm:$0xff]  ;;  %v1147_v31 = vld [vmem:[#allocation2 + $0x131] sm:$0xff]  ;;  %v4188_v35 = vpack.c.bf16 %v760_v29, %v759_v33 }
 0x158   : > { %v4190_v39 = vpack.c.bf16 %v1147_v31, %v1146_v30  ;;  %3291 = vmatmul.msk.bf16.gmra.mxu1 %vm635_vm1, %v4186_v34 }
 0x159   : > { %v570_v40 = vpop.f32.mrf.mxu0  ;;  %3311 = vmatmul.msk.bf16.gmra.mxu2 %vm635_vm1, %v4188_v35 }
 0x15a   : > { %v571_v41 = vadd.f32 %v3955_v13, %v570_v40  ;;  %3331 = vmatmul.msk.bf16.gmra.mxu3 %vm635_vm1, %v4190_v39 }
 0x15c   : > { %v622_v42 = vmax.f32 %v571_v41, 0.0  ;;  %v744_v41 = vld [vmem:[#allocation2 + $0x2f] sm:$0xff] }
 0x15d   : > { %v811_v59 = vld [vmem:[#allocation2 + $0x148] sm:$0xff] }
 0x15e   : > { %728 = vst.msk [vmem:[#allocation2 + $0x150] sm:$0xff] %vm635_vm1, %v622_v42  ;;  %v761_v60 = vld [vmem:[#allocation2 + $0x147] sm:$0xff] }
 0x161   : > { %v573_v44 = vpop.f32.mrf.mxu0 }
 0x162   : > { %v574_v46 = vadd.f32 %v3955_v13, %v573_v44 }
 0x164   : > { %v623_v48 = vmax.f32 %v574_v46, 0.0  ;;  %3284 = vmatmul.msk.bf16.gmra.mxu0 %vm635_vm1, %v4201_v47  ;;  %v743_v46 = vld [vmem:[#allocation2 + $0x27] sm:$0xff] }
 0x165   : > { %v812_v49 = vld [vmem:[#allocation2 + $0x150] sm:$0xff] }
 0x166   : > { %v762_v52 = vld [vmem:[#allocation2 + $0x14f] sm:$0xff]  ;;  %729 = vst.msk [vmem:[#allocation2 + $0x168] sm:$0xff] %vm635_vm1, %v623_v48  ;;  %v4206_v61 = vpack.c.bf16 %v812_v49, %v811_v59 }
 0x167   : > { %v1148_v53 = vld [vmem:[#allocation2 + $0x149] sm:$0xff]  ;;  %v1149_v58 = vld [vmem:[#allocation2 + $0x151] sm:$0xff]  ;;  %v4208_v62 = vpack.c.bf16 %v762_v52, %v761_v60  ;;  %v4240_v52 = vpack.c.bf16 %v744_v41, %v743_v46 }
 0x168   : > { %v4210_v63 = vpack.c.bf16 %v1149_v58, %v1148_v53  ;;  %3292 = vmatmul.msk.bf16.gmra.mxu1 %vm635_vm1, %v4206_v61 }
 0x169   : > { %v575_v0 = vpop.f32.mrf.mxu0  ;;  %3312 = vmatmul.msk.bf16.gmra.mxu2 %vm635_vm1, %v4208_v62 }
 0x16a   : > { %v576_v1 = vadd.f32 %v3955_v13, %v575_v0  ;;  %3332 = vmatmul.msk.bf16.gmra.mxu3 %vm635_vm1, %v4210_v63 }
 0x16c   : > { %v624_v5 = vmax.f32 %v576_v1, 0.0 }
 0x16d   : > { %v813_v24 = vld [vmem:[#allocation2 + $0x168] sm:$0xff] }
 0x16e   : > { %730 = vst.msk [vmem:[#allocation2 + $0x170] sm:$0xff] %vm635_vm1, %v624_v5  ;;  %v763_v25 = vld [vmem:[#allocation2 + $0x167] sm:$0xff] }
 0x171   : > { %v578_v9 = vpop.f32.mrf.mxu0 }
 0x172   : > { %v579_v10 = vadd.f32 %v3955_v13, %v578_v9 }
 0x174   : > { %v625_v16 = vmax.f32 %v579_v10, 0.0  ;;  %3302 = vmatmul.msk.bf16.vlgmr.msra.gmra.mxu0 %vm635_vm1, %v773_v8 }
 0x175   : > { %v814_v17 = vld [vmem:[#allocation2 + $0x170] sm:$0xff]  ;;  %v920_v29 = vpop.f32.mrf.mxu1 }
 0x176   : > { %v764_v23 = vld [vmem:[#allocation2 + $0x16f] sm:$0xff]  ;;  %731 = vst.msk [vmem:[#allocation2 + $0x188] sm:$0xff] %vm635_vm1, %v625_v16  ;;  %v4223_v27 = vpack.c.bf16 %v814_v17, %v813_v24 }
 0x177   : > { %v1150_v18 = vld [vmem:[#allocation2 + $0x169] sm:$0xff]  ;;  %v1151_v22 = vld [vmem:[#allocation2 + $0x171] sm:$0xff]  ;;  %v4225_v28 = vpack.c.bf16 %v764_v23, %v763_v25 }
 0x178   : > { %v4227_v30 = vpack.c.bf16 %v1151_v22, %v1150_v18  ;;  %3293 = vmatmul.msk.bf16.gmra.mxu1 %vm635_vm1, %v4223_v27  ;;  %v746_v25 = vld [vmem:[#allocation2 + $0x4f] sm:$0xff] }
 0x179   : > { %v580_v31 = vpop.f32.mrf.mxu0  ;;  %3313 = vmatmul.msk.bf16.gmra.mxu2 %vm635_vm1, %v4225_v28 }
 0x17a   : > { %v581_v32 = vadd.f32 %v3955_v13, %v580_v31  ;;  %3333 = vmatmul.msk.bf16.gmra.mxu3 %vm635_vm1, %v4227_v30 }
 0x17c   : > { %v626_v33 = vmax.f32 %v581_v32, 0.0  ;;  %v1063_v40 = vpop.f32.mrf.mxu2 }
 0x17d   : > { %v1064_v42 = vadd.f32 %v1063_v40, %v920_v29  ;;  %v1257_v43 = vpop.f32.mrf.mxu3  ;;  %v922_v44 = vpop.f32.mrf.mxu1  ;;  %v815_v5 = vld [vmem:[#allocation2 + $0x188] sm:$0xff] }
 0x17e   : > { %732 = vst.msk [vmem:[#allocation2 + $0x190] sm:$0xff] %vm635_vm1, %v626_v33  ;;  %v765_v6 = vld [vmem:[#allocation2 + $0x187] sm:$0xff] }
 0x17f   : > { %v4237_v48 = vadd.f32 %v1257_v43, %v1064_v42  ;;  %v745_v40 = vld [vmem:[#allocation2 + $0x47] sm:$0xff] }
 0x180   : > { %v4264_v43 = vpack.c.bf16 %v746_v25, %v745_v40  ;;  %v1129_v25 = vld [vmem:[#allocation2 + $0x11] sm:$0xff] }
 0x181   : > { %v583_v45 = vpop.f32.mrf.mxu0 }
 0x182   : > { %v584_v49 = vadd.f32 %v3955_v13, %v583_v45 }
 0x184   : > { %v627_v53 = vmax.f32 %v584_v49, 0.0  ;;  %3303 = vmatmul.msk.bf16.gmra.mxu0 %vm635_vm1, %v4240_v52  ;;  %v1065_v1 = vpop.f32.mrf.mxu2 }
 0x185   : > { %v816_v58 = vld [vmem:[#allocation2 + $0x190] sm:$0xff]  ;;  %v1066_v7 = vadd.f32 %v1065_v1, %v922_v44  ;;  %v1259_v8 = vpop.f32.mrf.mxu3  ;;  %v925_v11 = vpop.f32.mrf.mxu1 }
 0x186   : > { %v766_v59 = vld [vmem:[#allocation2 + $0x18f] sm:$0xff]  ;;  %733 = vst.msk [vmem:[#allocation2 + $0x1a8] sm:$0xff] %vm635_vm1, %v627_v53  ;;  %v4245_v9 = vpack.c.bf16 %v816_v58, %v815_v5 }
 0x187   : > { %v1152_v60 = vld [vmem:[#allocation2 + $0x189] sm:$0xff]  ;;  %v1153_v0 = vld [vmem:[#allocation2 + $0x191] sm:$0xff]  ;;  %v4247_v10 = vpack.c.bf16 %v766_v59, %v765_v6  ;;  %v4251_v23 = vadd.f32 %v1259_v8, %v1066_v7 }
 0x188   : > { %v4249_v16 = vpack.c.bf16 %v1153_v0, %v1152_v60  ;;  %3294 = vmatmul.msk.bf16.gmra.mxu1 %vm635_vm1, %v4245_v9 }
 0x189   : > { %v585_v17 = vpop.f32.mrf.mxu0  ;;  %3314 = vmatmul.msk.bf16.gmra.mxu2 %vm635_vm1, %v4247_v10 }
 0x18a   : > { %v586_v18 = vadd.f32 %v3955_v13, %v585_v17  ;;  %3334 = vmatmul.msk.bf16.gmra.mxu3 %vm635_vm1, %v4249_v16 }
 0x18c   : > { %v628_v22 = vmax.f32 %v586_v18, 0.0  ;;  %v1068_v24 = vpop.f32.mrf.mxu2 }
 0x18d   : > { %v1069_v29 = vadd.f32 %v1068_v24, %v925_v11  ;;  %v1262_v31 = vpop.f32.mrf.mxu3  ;;  %v927_v32 = vpop.f32.mrf.mxu1  ;;  %v817_v59 = vld [vmem:[#allocation2 + $0x1a8] sm:$0xff] }
 0x18e   : > { %734 = vst.msk [vmem:[#allocation2 + $0x1b0] sm:$0xff] %vm635_vm1, %v628_v22  ;;  %v767_v60 = vld [vmem:[#allocation2 + $0x1a7] sm:$0xff] }
 0x18f   : > { %v4261_v41 = vadd.f32 %v1262_v31, %v1069_v29  ;;  %v1128_v24 = vld [vmem:[#allocation2 + $0x9] sm:$0xff] }
 0x191   : > { %v588_v33 = vpop.f32.mrf.mxu0 }
 0x192   : > { %v589_v42 = vadd.f32 %v3955_v13, %v588_v33  ;;  %v1160_v33 = vpack.c.bf16 %v1129_v25, %v1128_v24 }
 0x194   : > { %v629_v44 = vmax.f32 %v589_v42, 0.0  ;;  %3304 = vmatmul.msk.bf16.gmra.mxu0 %vm635_vm1, %v4264_v43  ;;  %v1070_v58 = vpop.f32.mrf.mxu2 }
 0x195   : > { %v818_v45 = vld [vmem:[#allocation2 + $0x1b0] sm:$0xff]  ;;  %v1071_v0 = vadd.f32 %v1070_v58, %v927_v32  ;;  %v1264_v1 = vpop.f32.mrf.mxu3  ;;  %v930_v7 = vpop.f32.mrf.mxu1 }
 0x196   : > { %v768_v46 = vld [vmem:[#allocation2 + $0x1af] sm:$0xff]  ;;  %735 = vst.msk [vmem:[#allocation2 + $0x1c8] sm:$0xff] %vm635_vm1, %v629_v44  ;;  %v4269_v5 = vpack.c.bf16 %v818_v45, %v817_v59 }
 0x197   : > { %v1154_v49 = vld [vmem:[#allocation2 + $0x1a9] sm:$0xff]  ;;  %v1155_v53 = vld [vmem:[#allocation2 + $0x1b1] sm:$0xff]  ;;  %v4271_v6 = vpack.c.bf16 %v768_v46, %v767_v60  ;;  %v4275_v17 = vadd.f32 %v1264_v1, %v1071_v0 }
 0x198   : > { %v4273_v8 = vpack.c.bf16 %v1155_v53, %v1154_v49  ;;  %3295 = vmatmul.msk.bf16.gmra.mxu1 %vm635_vm1, %v4269_v5 }
 0x199   : > { %v590_v11 = vpop.f32.mrf.mxu0  ;;  %3315 = vmatmul.msk.bf16.gmra.mxu2 %vm635_vm1, %v4271_v6 }
 0x19a   : > { %v591_v18 = vadd.f32 %v3955_v13, %v590_v11  ;;  %3335 = vmatmul.msk.bf16.gmra.mxu3 %vm635_vm1, %v4273_v8 }
 0x19c   : > { %v630_v22 = vmax.f32 %v591_v18, 0.0  ;;  %v1073_v29 = vpop.f32.mrf.mxu2 }
 0x19d   : > { %v1074_v31 = vadd.f32 %v1073_v29, %v930_v7  ;;  %v1267_v32 = vpop.f32.mrf.mxu3  ;;  %v932_v40 = vpop.f32.mrf.mxu1  ;;  %v819_v0 = vld [vmem:[#allocation2 + $0x1c8] sm:$0xff] }
 0x19e   : > { %736 = vst.msk [vmem:[#allocation2 + $0x1d0] sm:$0xff] %vm635_vm1, %v630_v22  ;;  %v769_v1 = vld [vmem:[#allocation2 + $0x1c7] sm:$0xff] }
 0x19f   : > { %v4285_v44 = vadd.f32 %v1267_v32, %v1074_v31 }
 0x1a1   : > { %v593_v42 = vpop.f32.mrf.mxu0 }
 0x1a2   : > { %v594_v45 = vadd.f32 %v3955_v13, %v593_v42 }
 0x1a4   : > { %v631_v46 = vmax.f32 %v594_v45, 0.0  ;;  %3322 = vmatmul.msk.bf16.vlgmr.msrb.gmra.mxu0 %vm635_vm1, %v1160_v33  ;;  %v1075_v60 = vpop.f32.mrf.mxu2  ;;  %v1130_v45 = vld [vmem:[#allocation2 + $0x29] sm:$0xff] }
 0x1a5   : > { %v820_v49 = vld [vmem:[#allocation2 + $0x1d0] sm:$0xff]  ;;  %v1076_v7 = vadd.f32 %v1075_v60, %v932_v40  ;;  %v1269_v11 = vpop.f32.mrf.mxu3  ;;  %v935_v24 = vpop.f32.mrf.mxu1  ;;  %v3512_v40 = vld [vmem:[#allocation6 + $0x40] sm:$0xff] }
 0x1a6   : > { %v770_v53 = vld [vmem:[#allocation2 + $0x1cf] sm:$0xff]  ;;  %737 = vst.msk [vmem:[#allocation2 + $0x1e8] sm:$0xff] %vm635_vm1, %v631_v46  ;;  %v4290_v18 = vpack.c.bf16 %v820_v49, %v819_v0  ;;  %2597 = vmatpush.bf16.msra.mxu2 %v3512_v40 }
 0x1a7   : > { %v1156_v58 = vld [vmem:[#allocation2 + $0x1c9] sm:$0xff]  ;;  %v1157_v59 = vld [vmem:[#allocation2 + $0x1d1] sm:$0xff]  ;;  %v4292_v22 = vpack.c.bf16 %v770_v53, %v769_v1  ;;  %v4296_v31 = vadd.f32 %v1269_v11, %v1076_v7 }
 0x1a8   : > { %v4294_v25 = vpack.c.bf16 %v1157_v59, %v1156_v58  ;;  %3296 = vmatmul.msk.bf16.gmra.mxu1 %vm635_vm1, %v4290_v18  ;;  %v1131_v46 = vld [vmem:[#allocation2 + $0x31] sm:$0xff] }
 0x1a9   : > { %v595_v29 = vpop.f32.mrf.mxu0  ;;  %4933 = vst [vmem:[#allocation13_spill] sm:$0xff] %v4296_v31  ;;  %3316 = vmatmul.msk.bf16.gmra.mxu2 %vm635_vm1, %v4292_v22  ;;  %v1161_v1 = vpack.c.bf16 %v1131_v46, %v1130_v45  ;;  %v3511_v7 = vld [vmem:[#allocation6 + $0x38] sm:$0xff]  ;;  %v3510_v11 = vld [vmem:[#allocation6 + $0x30] sm:$0xff] }
 0x1aa   : > { %4932 = vst [vmem:[#allocation12_spill] sm:$0xff] %v4294_v25  ;;  %v596_v32 = vadd.f32 %v3955_v13, %v595_v29  ;;  %3336 = vmatmul.msk.bf16.gmra.mxu3 %vm635_vm1, %v4294_v25  ;;  %2371 = vmatpush.bf16.msra.mxu1 %v3511_v7 }
 0x1ab   : > { %2145 = vmatpush.bf16.msra.mxu0 %v3510_v11 }
 0x1ac   : > { %v632_v33 = vmax.f32 %v596_v32, 0.0  ;;  %v1078_v42 = vpop.f32.mrf.mxu2 }
 0x1ad   : > { %v1079_v49 = vadd.f32 %v1078_v42, %v935_v24  ;;  %v1272_v53 = vpop.f32.mrf.mxu3  ;;  %v937_v58 = vpop.f32.mrf.mxu1  ;;  %v821_v31 = vld [vmem:[#allocation2 + $0x1e8] sm:$0xff] }
 0x1ae   : > { %738 = vst.msk [vmem:[#allocation2 + $0x1f0] sm:$0xff] %vm635_vm1, %v632_v33 }
 0x1af   : > { %v4306_v60 = vadd.f32 %v1272_v53, %v1079_v49  ;;  %v771_v49 = vld [vmem:[#allocation2 + $0x1e7] sm:$0xff] }
 0x1b1   : > { %v598_v59 = vpop.f32.mrf.mxu0  ;;  %4934 = vst [vmem:[#allocation14_spill] sm:$0xff] %v4306_v60 }
 0x1b2   : > { %v599_v0 = vadd.f32 %v3955_v13, %v598_v59 }
 0x1b4   : > { %v633_v29 = vmax.f32 %v599_v0, 0.0  ;;  %3323 = vmatmul.msk.bf16.gmra.mxu0 %vm635_vm1, %v1161_v1  ;;  %v1080_v42 = vpop.f32.mrf.mxu2 }
 0x1b5   : > { %v822_v32 = vld [vmem:[#allocation2 + $0x1f0] sm:$0xff]  ;;  %v1081_v53 = vadd.f32 %v1080_v42, %v937_v58  ;;  %v1274_v60 = vpop.f32.mrf.mxu3  ;;  %v940_v46 = vpop.f32.mrf.mxu1 }
 0x1b6   : > { %v772_v33 = vld [vmem:[#allocation2 + $0x1ef] sm:$0xff]  ;;  %739 = vst.msk [vmem:[#allocation2 + $0x208] sm:$0xff] %vm635_vm1, %v633_v29  ;;  %v4311_v59 = vpack.c.bf16 %v822_v32, %v821_v31 }
 0x1b7   : > { %v1158_v24 = vld [vmem:[#allocation2 + $0x1e9] sm:$0xff]  ;;  %v1159_v40 = vld [vmem:[#allocation2 + $0x1f1] sm:$0xff]  ;;  %v4313_v45 = vpack.c.bf16 %v772_v33, %v771_v49  ;;  %v4317_v25 = vadd.f32 %v1274_v60, %v1081_v53 }
 0x1b8   : > { %v4315_v0 = vpack.c.bf16 %v1159_v40, %v1158_v24  ;;  %3297 = vmatmul.msk.bf16.gmra.mxu1 %vm635_vm1, %v4311_v59  ;;  %v1132_v29 = vld [vmem:[#allocation2 + $0x49] sm:$0xff]  ;;  %v1133_v32 = vld [vmem:[#allocation2 + $0x51] sm:$0xff] }
 0x1b9   : > { %v600_v7 = vpop.f32.mrf.mxu0  ;;  %4936 = vst [vmem:[#allocation16_spill] sm:$0xff] %v4317_v25  ;;  %3317 = vmatmul.msk.bf16.gmra.mxu2 %vm635_vm1, %v4313_v45  ;;  %v1162_v42 = vpack.c.bf16 %v1133_v32, %v1132_v29 }
 0x1ba   : > { %4935 = vst [vmem:[#allocation15_spill] sm:$0xff] %v4315_v0  ;;  %v601_v11 = vadd.f32 %v3955_v13, %v600_v7  ;;  %3337 = vmatmul.msk.bf16.gmra.mxu3 %vm635_vm1, %v4315_v0 }
 0x1bc   : > { %v634_v58 = vmax.f32 %v601_v11, 0.0  ;;  %v1083_v31 = vpop.f32.mrf.mxu2 }
 0x1bd   : > { %v1084_v33 = vadd.f32 %v1083_v31, %v940_v46  ;;  %v1277_v60 = vpop.f32.mrf.mxu3  ;;  %v942_v24 = vpop.f32.mrf.mxu1 }
 0x1be   : > { %740 = vst.msk [vmem:[#allocation2 + $0x210] sm:$0xff] %vm635_vm1, %v634_v58 }
 0x1bf   : > { %v4327_v13 = vadd.f32 %v1277_v60, %v1084_v33 }
 0x1c1   : > { %v905_v40 = vpop.f32.mrf.mxu0 }
 0x1c4   : > { %3324 = vmatmul.msk.bf16.gmra.mxu0 %vm635_vm1, %v1162_v42  ;;  %v1085_v49 = vpop.f32.mrf.mxu2 }
 0x1c5   : > { %v1086_v53 = vadd.f32 %v1085_v49, %v942_v24  ;;  %v1279_v7 = vpop.f32.mrf.mxu3  ;;  %v945_v11 = vpop.f32.mrf.mxu1 }
 0x1c7   : > { %v4330_v0 = vadd.f32 %v1279_v7, %v1086_v53 }
 0x1c8   : > { %3342 = vmatmul.msk.bf16.vlgmr.msrb.gmra.mxu1 %vm635_vm1, %v4240_v52 }
 0x1c9   : > { %v907_v25 = vpop.f32.mrf.mxu0  ;;  %3362 = vmatmul.msk.bf16.vlgmr.msrb.gmra.mxu2 %vm635_vm1, %v4181_v26 }
 0x1ca   : > { %3382 = vmatmul.msk.bf16.vlgmr.msrb.gmra.mxu3 %vm635_vm1, %v1161_v1 }
 0x1cc   : > { %v1088_v46 = vpop.f32.mrf.mxu2 }
 0x1cd   : > { %v1089_v58 = vadd.f32 %v1088_v46, %v945_v11  ;;  %v1282_v31 = vpop.f32.mrf.mxu3  ;;  %v947_v29 = vpop.f32.mrf.mxu1 }
 0x1cf   : > { %v4337_v33 = vadd.f32 %v1282_v31, %v1089_v58 }
 0x1d1   : > { %v910_v32 = vpop.f32.mrf.mxu0 }
 0x1d4   : > { %3402 = vmatmul.msk.bf16.vlgmr.msra.gmra.mxu0 %vm635_vm1, %v4264_v43  ;;  %v1090_v60 = vpop.f32.mrf.mxu2 }
 0x1d5   : > { %v1091_v24 = vadd.f32 %v1090_v60, %v947_v29  ;;  %v1284_v49 = vpop.f32.mrf.mxu3  ;;  %v950_v53 = vpop.f32.mrf.mxu1 }
 0x1d7   : > { %v4341_v7 = vadd.f32 %v1284_v49, %v1091_v24 }
 0x1d8   : > { %3343 = vmatmul.msk.bf16.gmra.mxu1 %vm635_vm1, %v4264_v43 }
 0x1d9   : > { %v912_v52 = vpop.f32.mrf.mxu0  ;;  %4937 = vst [vmem:[#allocation17_spill] sm:$0xff] %v4341_v7  ;;  %3363 = vmatmul.msk.bf16.gmra.mxu2 %vm635_vm1, %v4201_v47 }
 0x1da   : > { %3383 = vmatmul.msk.bf16.gmra.mxu3 %vm635_vm1, %v1162_v42 }
 0x1dc   : > { %v1093_v26 = vpop.f32.mrf.mxu2 }
 0x1dd   : > { %v1094_v1 = vadd.f32 %v1093_v26, %v950_v53  ;;  %v1287_v11 = vpop.f32.mrf.mxu3  ;;  %v952_v46 = vpop.f32.mrf.mxu1 }
 0x1df   : > { %v4348_v31 = vadd.f32 %v1287_v11, %v1094_v1 }
 0x1e1   : > { %v915_v58 = vpop.f32.mrf.mxu0  ;;  %4938 = vst [vmem:[#allocation18_spill] sm:$0xff] %v4348_v31 }
 0x1e4   : > { %3403 = vmatmul.msk.bf16.gmra.mxu0 %vm635_vm1, %v4078_v51  ;;  %v1095_v29 = vpop.f32.mrf.mxu2 }
 0x1e5   : > { %v1096_v60 = vadd.f32 %v1095_v29, %v952_v46  ;;  %v1289_v24 = vpop.f32.mrf.mxu3  ;;  %v955_v49 = vpop.f32.mrf.mxu1 }
 0x1e7   : > { %v4352_v7 = vadd.f32 %v1289_v24, %v1096_v60 }
 0x1e8   : > { %3344 = vmatmul.msk.bf16.gmra.mxu1 %vm635_vm1, %v4078_v51 }
 0x1e9   : > { %v917_v43 = vpop.f32.mrf.mxu0  ;;  %4939 = vst [vmem:[#allocation19_spill] sm:$0xff] %v4352_v7  ;;  %3364 = vmatmul.msk.bf16.gmra.mxu2 %vm635_vm1, %v4076_v50 }
 0x1ea   : > { %3384 = vmatmul.msk.bf16.gmra.mxu3 %vm635_vm1, %v4081_v54 }
 0x1ec   : > { %v1098_v47 = vpop.f32.mrf.mxu2 }
 0x1ed   : > { %v1099_v42 = vadd.f32 %v1098_v47, %v955_v49  ;;  %v1292_v53 = vpop.f32.mrf.mxu3  ;;  %v957_v26 = vpop.f32.mrf.mxu1 }
 0x1ef   : > { %v4360_v11 = vadd.f32 %v1292_v53, %v1099_v42 }
 0x1f1   : > { %v1048_v1 = vpop.f32.mrf.mxu0 }
 0x1f2   : > { %v1049_v46 = vadd.f32 %v1048_v1, %v905_v40 }
 0x1f4   : > { %3404 = vmatmul.msk.bf16.gmra.mxu0 %vm635_vm1, %v4096_v3  ;;  %v1100_v29 = vpop.f32.mrf.mxu2 }
 0x1f5   : > { %v1101_v60 = vadd.f32 %v1100_v29, %v957_v26  ;;  %v1294_v51 = vpop.f32.mrf.mxu3  ;;  %v960_v24 = vpop.f32.mrf.mxu1 }
 0x1f7   : > { %v4364_v50 = vadd.f32 %v1294_v51, %v1101_v60 }
 0x1f8   : > { %3345 = vmatmul.msk.bf16.gmra.mxu1 %vm635_vm1, %v4096_v3 }
 0x1f9   : > { %v1050_v7 = vpop.f32.mrf.mxu0  ;;  %3365 = vmatmul.msk.bf16.gmra.mxu2 %vm635_vm1, %v4094_v2 }
 0x1fa   : > { %v1051_v31 = vadd.f32 %v1050_v7, %v907_v25  ;;  %3385 = vmatmul.msk.bf16.gmra.mxu3 %vm635_vm1, %v4098_v4 }
 0x1fc   : > { %v1103_v54 = vpop.f32.mrf.mxu2 }
 0x1fd   : > { %v1104_v40 = vadd.f32 %v1103_v54, %v960_v24  ;;  %v1297_v49 = vpop.f32.mrf.mxu3  ;;  %v962_v47 = vpop.f32.mrf.mxu1 }
 0x1ff   : > { %v4372_v53 = vadd.f32 %v1297_v49, %v1104_v40 }
 0x201   : > { %v1053_v42 = vpop.f32.mrf.mxu0 }
 0x202   : > { %v1054_v26 = vadd.f32 %v1053_v42, %v910_v32 }
 0x204   : > { %3405 = vmatmul.msk.bf16.gmra.mxu0 %vm635_vm1, %v4114_v20  ;;  %v1105_v25 = vpop.f32.mrf.mxu2 }
 0x205   : > { %v1106_v7 = vadd.f32 %v1105_v25, %v962_v47  ;;  %v1299_v3 = vpop.f32.mrf.mxu3  ;;  %v965_v1 = vpop.f32.mrf.mxu1 }
 0x207   : > { %v4376_v2 = vadd.f32 %v1299_v3, %v1106_v7 }
 0x208   : > { %3346 = vmatmul.msk.bf16.gmra.mxu1 %vm635_vm1, %v4114_v20 }
 0x209   : > { %v1055_v29 = vpop.f32.mrf.mxu0  ;;  %3366 = vmatmul.msk.bf16.gmra.mxu2 %vm635_vm1, %v4112_v19 }
 0x20a   : > { %v1056_v60 = vadd.f32 %v1055_v29, %v912_v52  ;;  %3386 = vmatmul.msk.bf16.gmra.mxu3 %vm635_vm1, %v4116_v21 }
 0x20c   : > { %v1108_v4 = vpop.f32.mrf.mxu2 }
 0x20d   : > { %v1109_v32 = vadd.f32 %v1108_v4, %v965_v1  ;;  %v1302_v51 = vpop.f32.mrf.mxu3  ;;  %v967_v24 = vpop.f32.mrf.mxu1 }
 0x20f   : > { %v4384_v40 = vadd.f32 %v1302_v51, %v1109_v32 }
 0x211   : > { %v1058_v54 = vpop.f32.mrf.mxu0 }
 0x212   : > { %v1059_v49 = vadd.f32 %v1058_v54, %v915_v58 }
 0x214   : > { %3406 = vmatmul.msk.bf16.gmra.mxu0 %vm635_vm1, %v4132_v37  ;;  %v1110_v52 = vpop.f32.mrf.mxu2 }
 0x215   : > { %v1111_v47 = vadd.f32 %v1110_v52, %v967_v24  ;;  %v1304_v20 = vpop.f32.mrf.mxu3  ;;  %v970_v42 = vpop.f32.mrf.mxu1 }
 0x217   : > { %v4388_v19 = vadd.f32 %v1304_v20, %v1111_v47 }
 0x218   : > { %3347 = vmatmul.msk.bf16.gmra.mxu1 %vm635_vm1, %v4132_v37 }
 0x219   : > { %v1060_v25 = vpop.f32.mrf.mxu0  ;;  %3367 = vmatmul.msk.bf16.gmra.mxu2 %vm635_vm1, %v4130_v36 }
 0x21a   : > { %v1061_v7 = vadd.f32 %v1060_v25, %v917_v43  ;;  %3387 = vmatmul.msk.bf16.gmra.mxu3 %vm635_vm1, %v4134_v38 }
 0x21c   : > { %v1113_v21 = vpop.f32.mrf.mxu2 }
 0x21d   : > { %v1114_v58 = vadd.f32 %v1113_v21, %v970_v42  ;;  %v1307_v3 = vpop.f32.mrf.mxu3  ;;  %v972_v1 = vpop.f32.mrf.mxu1 }
 0x21f   : > { %v4396_v4 = vadd.f32 %v1307_v3, %v1114_v58 }
 0x221   : > { %v1242_v29 = vpop.f32.mrf.mxu0 }
 0x222   : > { %v1322_v32 = vadd.f32 %v1242_v29, %v1049_v46 }
 0x224   : > { %3407 = vmatmul.msk.bf16.gmra.mxu0 %vm635_vm1, %v4150_v56  ;;  %v1115_v43 = vpop.f32.mrf.mxu2 }
 0x225   : > { %v1116_v51 = vadd.f32 %v1115_v43, %v972_v1  ;;  %v1309_v37 = vpop.f32.mrf.mxu3  ;;  %v975_v24 = vpop.f32.mrf.mxu1 }
 0x227   : > { %v4400_v36 = vadd.f32 %v1309_v37, %v1116_v51 }
 0x228   : > { %3348 = vmatmul.msk.bf16.gmra.mxu1 %vm635_vm1, %v4150_v56 }
 0x229   : > { %v1244_v54 = vpop.f32.mrf.mxu0  ;;  %3368 = vmatmul.msk.bf16.gmra.mxu2 %vm635_vm1, %v4148_v55 }
 0x22a   : > { %v1323_v52 = vadd.f32 %v1244_v54, %v1051_v31  ;;  %3388 = vmatmul.msk.bf16.gmra.mxu3 %vm635_vm1, %v4152_v57 }
 0x22c   : > { %v1118_v38 = vpop.f32.mrf.mxu2 }
 0x22d   : > { %v1119_v46 = vadd.f32 %v1118_v38, %v975_v24  ;;  %v1312_v47 = vpop.f32.mrf.mxu3  ;;  %v977_v20 = vpop.f32.mrf.mxu1 }
 0x22f   : > { %v4408_v25 = vadd.f32 %v1312_v47, %v1119_v46 }
 0x231   : > { %v1247_v42 = vpop.f32.mrf.mxu0 }
 0x232   : > { %v1324_v21 = vadd.f32 %v1247_v42, %v1054_v26 }
 0x234   : > { %3408 = vmatmul.msk.bf16.gmra.mxu0 %vm635_vm1, %v4168_v14  ;;  %v1120_v31 = vpop.f32.mrf.mxu2 }
 0x235   : > { %v1121_v58 = vadd.f32 %v1120_v31, %v977_v20  ;;  %v1314_v56 = vpop.f32.mrf.mxu3  ;;  %v980_v3 = vpop.f32.mrf.mxu1 }
 0x237   : > { %v4412_v55 = vadd.f32 %v1314_v56, %v1121_v58 }
 0x238   : > { %3349 = vmatmul.msk.bf16.gmra.mxu1 %vm635_vm1, %v4168_v14 }
 0x239   : > { %v1249_v1 = vpop.f32.mrf.mxu0  ;;  %3369 = vmatmul.msk.bf16.gmra.mxu2 %vm635_vm1, %v4166_v12 }
 0x23a   : > { %v1325_v29 = vadd.f32 %v1249_v1, %v1056_v60  ;;  %3389 = vmatmul.msk.bf16.gmra.mxu3 %vm635_vm1, %v4170_v15  ;;  %v3513_v60 = vld [vmem:[%s4916_s5] sm:$0xff] }
 0x23b   : > { %2862 = vmatpush.bf16.msra.mxu3 %v3513_v60 }
 0x23c   : > { %v1123_v57 = vpop.f32.mrf.mxu2 }
 0x23d   : > { %v1124_v26 = vadd.f32 %v1123_v57, %v980_v3  ;;  %v1317_v43 = vpop.f32.mrf.mxu3  ;;  %v982_v51 = vpop.f32.mrf.mxu1 }
 0x23f   : > { %v4420_v24 = vadd.f32 %v1317_v43, %v1124_v26 }
 0x241   : > { %v1252_v37 = vpop.f32.mrf.mxu0 }
 0x242   : > { %v1326_v54 = vadd.f32 %v1252_v37, %v1059_v49 }
 0x244   : > { %3409 = vmatmul.msk.bf16.gmra.mxu0 %vm635_vm1, %v4188_v35  ;;  %v1125_v12 = vpop.f32.mrf.mxu2 }
 0x245   : > { %v1126_v14 = vadd.f32 %v1125_v12, %v982_v51  ;;  %v1319_v38 = vpop.f32.mrf.mxu3  ;;  %v1468_v15 = vpop.f32.mrf.mxu1 }
 0x246   : > { %v1548_v20 = vadd.f32 %v1468_v15, %v1322_v32 }
 0x247   : > { %v4427_v47 = vadd.f32 %v1319_v38, %v1126_v14 }
 0x248   : > { %3350 = vmatmul.msk.bf16.gmra.mxu1 %vm635_vm1, %v4188_v35 }
 0x249   : > { %v1254_v46 = vpop.f32.mrf.mxu0  ;;  %3370 = vmatmul.msk.bf16.gmra.mxu2 %vm635_vm1, %v4186_v34 }
 0x24a   : > { %v1327_v42 = vadd.f32 %v1254_v46, %v1061_v7  ;;  %3390 = vmatmul.msk.bf16.gmra.mxu3 %vm635_vm1, %v4190_v39 }
 0x24c   : > { %v1694_v49 = vpop.f32.mrf.mxu2 }
 0x24d   : > { %v1774_v31 = vadd.f32 %v1694_v49, %v1548_v20  ;;  %v1920_v58 = vpop.f32.mrf.mxu3  ;;  %v1470_v56 = vpop.f32.mrf.mxu1 }
 0x24e   : > { %v1549_v57 = vadd.f32 %v1470_v56, %v1323_v52 }
 0x24f   : > { %v2000_v1 = vadd.f32 %v1920_v58, %v1774_v31 }
 0x251   : > { %v2147_v3 = vpop.f32.mrf.mxu0 }
 0x252   : > { %v4435_v26 = vadd.f32 %v2147_v3, %v2000_v1 }
 0x254   : > { %3410 = vmatmul.msk.bf16.gmra.mxu0 %vm635_vm1, %v4208_v62  ;;  %v1696_v7 = vpop.f32.mrf.mxu2 }
 0x255   : > { %v1775_v35 = vadd.f32 %v1696_v7, %v1549_v57  ;;  %v1922_v32 = vpop.f32.mrf.mxu3  ;;  %v1473_v43 = vpop.f32.mrf.mxu1 }
 0x256   : > { %v1550_v37 = vadd.f32 %v1473_v43, %v1324_v21 }
 0x257   : > { %v2001_v51 = vadd.f32 %v1922_v32, %v1775_v35 }
 0x258   : > { %3351 = vmatmul.msk.bf16.gmra.mxu1 %vm635_vm1, %v4208_v62 }
 0x259   : > { %v2149_v34 = vpop.f32.mrf.mxu0  ;;  %3371 = vmatmul.msk.bf16.gmra.mxu2 %vm635_vm1, %v4206_v61 }
 0x25a   : > { %v4443_v39 = vadd.f32 %v2149_v34, %v2001_v51  ;;  %3391 = vmatmul.msk.bf16.gmra.mxu3 %vm635_vm1, %v4210_v63 }
 0x25c   : > { %v1699_v52 = vpop.f32.mrf.mxu2 }
 0x25d   : > { %v1776_v60 = vadd.f32 %v1699_v52, %v1550_v37  ;;  %v1925_v12 = vpop.f32.mrf.mxu3  ;;  %v1475_v14 = vpop.f32.mrf.mxu1 }
 0x25e   : > { %v1551_v46 = vadd.f32 %v1475_v14, %v1325_v29 }
 0x25f   : > { %v2002_v15 = vadd.f32 %v1925_v12, %v1776_v60 }
 0x261   : > { %v2152_v38 = vpop.f32.mrf.mxu0 }
 0x262   : > { %v4447_v20 = vadd.f32 %v2152_v38, %v2002_v15 }
 0x264   : > { %3411 = vmatmul.msk.bf16.gmra.mxu0 %vm635_vm1, %v4225_v28  ;;  %v1701_v62 = vpop.f32.mrf.mxu2 }
 0x265   : > { %v1777_v21 = vadd.f32 %v1701_v62, %v1551_v46  ;;  %v1927_v61 = vpop.f32.mrf.mxu3  ;;  %v1478_v49 = vpop.f32.mrf.mxu1 }
 0x266   : > { %v1552_v56 = vadd.f32 %v1478_v49, %v1326_v54 }
 0x267   : > { %v2003_v58 = vadd.f32 %v1927_v61, %v1777_v21 }
 0x268   : > { %3352 = vmatmul.msk.bf16.gmra.mxu1 %vm635_vm1, %v4225_v28 }
 0x269   : > { %v2154_v31 = vpop.f32.mrf.mxu0  ;;  %3372 = vmatmul.msk.bf16.gmra.mxu2 %vm635_vm1, %v4223_v27 }
 0x26a   : > { %v4455_v63 = vadd.f32 %v2154_v31, %v2003_v58  ;;  %3392 = vmatmul.msk.bf16.gmra.mxu3 %vm635_vm1, %v4227_v30 }
 0x26c   : > { %v1704_v29 = vpop.f32.mrf.mxu2 }
 0x26d   : > { %v1778_v3 = vadd.f32 %v1704_v29, %v1552_v56  ;;  %v1930_v1 = vpop.f32.mrf.mxu3  ;;  %v1480_v57 = vpop.f32.mrf.mxu1 }
 0x26e   : > { %v1553_v32 = vadd.f32 %v1480_v57, %v1327_v42 }
 0x26f   : > { %v2004_v35 = vadd.f32 %v1930_v1, %v1778_v3 }
 0x271   : > { %v2157_v7 = vpop.f32.mrf.mxu0 }
 0x272   : > { %v4459_v43 = vadd.f32 %v2157_v7, %v2004_v35 }
 0x274   : > { %3412 = vmatmul.msk.bf16.gmra.mxu0 %vm635_vm1, %v4247_v10  ;;  %v1706_v28 = vpop.f32.mrf.mxu2 }
 0x275   : > { %v1779_v54 = vadd.f32 %v1706_v28, %v1553_v32  ;;  %v1932_v27 = vpop.f32.mrf.mxu3  ;;  %v1483_v34 = vpop.f32.mrf.mxu1 }
 0x276   : > { %v1554_v30 = vadd.f32 %v1483_v34, %v4237_v48 }
 0x277   : > { %v2005_v37 = vadd.f32 %v1932_v27, %v1779_v54  ;;  %v4941_v27 = vld [vmem:[#allocation13_spill] sm:$0xff] }
 0x278   : > { %3353 = vmatmul.msk.bf16.gmra.mxu1 %vm635_vm1, %v4247_v10 }
 0x279   : > { %v2159_v51 = vpop.f32.mrf.mxu0  ;;  %3373 = vmatmul.msk.bf16.gmra.mxu2 %vm635_vm1, %v4245_v9 }
 0x27a   : > { %v4468_v42 = vadd.f32 %v2159_v51, %v2005_v37  ;;  %3393 = vmatmul.msk.bf16.gmra.mxu3 %vm635_vm1, %v4249_v16  ;;  %v4942_v37 = vld [vmem:[#allocation14_spill] sm:$0xff] }
 0x27c   : > { %v1709_v52 = vpop.f32.mrf.mxu2 }
 0x27d   : > { %v1780_v60 = vadd.f32 %v1709_v52, %v1554_v30  ;;  %v1935_v12 = vpop.f32.mrf.mxu3  ;;  %v1485_v14 = vpop.f32.mrf.mxu1  ;;  %v4943_v52 = vld [vmem:[#allocation15_spill] sm:$0xff] }
 0x27e   : > { %v1555_v46 = vadd.f32 %v1485_v14, %v4251_v23  ;;  %v2062_v14 = vld [vmem:[#allocation2 + $0x20f] sm:$0xff] }
 0x27f   : > { %v2006_v15 = vadd.f32 %v1935_v12, %v1780_v60  ;;  %v2061_v12 = vld [vmem:[#allocation2 + $0x207] sm:$0xff] }
 0x281   : > { %v2162_v38 = vpop.f32.mrf.mxu0 }
 0x282   : > { %v4473_v48 = vadd.f32 %v2162_v38, %v2006_v15 }
 0x284   : > { %3413 = vmatmul.msk.bf16.gmra.mxu0 %vm635_vm1, %v4271_v6  ;;  %v1711_v10 = vpop.f32.mrf.mxu2 }
 0x285   : > { %v1781_v9 = vadd.f32 %v1711_v10, %v1555_v46  ;;  %v1937_v62 = vpop.f32.mrf.mxu3  ;;  %v1488_v21 = vpop.f32.mrf.mxu1 }
 0x286   : > { %v1556_v16 = vadd.f32 %v1488_v21, %v4261_v41  ;;  %v2079_v21 = vpack.c.bf16 %v2062_v14, %v2061_v12  ;;  %v2259_v12 = vld [vmem:[#allocation2 + $0x48] sm:$0xff] }
 0x287   : > { %v2007_v49 = vadd.f32 %v1937_v62, %v1781_v9  ;;  %v4944_v9 = vld [vmem:[#allocation16_spill] sm:$0xff] }
 0x288   : > { %3354 = vmatmul.msk.bf16.gmra.mxu1 %vm635_vm1, %v4271_v6 }
 0x289   : > { %v2164_v61 = vpop.f32.mrf.mxu0  ;;  %3374 = vmatmul.msk.bf16.gmra.mxu2 %vm635_vm1, %v4269_v5 }
 0x28a   : > { %v4482_v23 = vadd.f32 %v2164_v61, %v2007_v49  ;;  %3394 = vmatmul.msk.bf16.gmra.mxu3 %vm635_vm1, %v4273_v8  ;;  %v4940_v8 = vld [vmem:[#allocation12_spill] sm:$0xff]  ;;  %v1611_v49 = vld [vmem:[#allocation2 + $0x210] sm:$0xff] }
 0x28b   : > { %v1610_v61 = vld [vmem:[#allocation2 + $0x208] sm:$0xff] }
 0x28c   : > { %v1714_v31 = vpop.f32.mrf.mxu2 }
 0x28d   : > { %v1782_v58 = vadd.f32 %v1714_v31, %v1556_v16  ;;  %v1940_v56 = vpop.f32.mrf.mxu3  ;;  %v1490_v29 = vpop.f32.mrf.mxu1  ;;  %v1836_v31 = vld [vmem:[#allocation2 + $0x209] sm:$0xff] }
 0x28e   : > { %v1557_v1 = vadd.f32 %v1490_v29, %v4275_v17 }
 0x28f   : > { %v4486_v3 = vadd.f32 %v1940_v56, %v1782_v58  ;;  %v1837_v58 = vld [vmem:[#allocation2 + $0x211] sm:$0xff] }
 0x294   : > { %3414 = vmatmul.msk.bf16.gmra.mxu0 %vm635_vm1, %v4292_v22  ;;  %v1716_v41 = vpop.f32.mrf.mxu2 }
 0x295   : > { %v4491_v6 = vadd.f32 %v1716_v41, %v1557_v1  ;;  %v4493_v5 = vpop.f32.mrf.mxu3  ;;  %v1493_v57 = vpop.f32.mrf.mxu1  ;;  %v4527_v1 = vpack.c.bf16 %v1611_v49, %v1610_v61  ;;  %v4529_v41 = vpack.c.bf16 %v1837_v58, %v1836_v31  ;;  %v2262_v31 = vld [vmem:[#allocation2 + $0x70] sm:$0xff] }
 0x296   : > { %v1558_v7 = vadd.f32 %v1493_v57, %v4285_v44  ;;  %v2063_v57 = vld [vmem:[#allocation2 + $0x227] sm:$0xff] }
 0x297   : > { %v2487_v58 = vld [vmem:[#allocation2 + $0x69] sm:$0xff] }
 0x298   : > { %3355 = vmatmul.msk.bf16.gmra.mxu1 %vm635_vm1, %v4292_v22 }
 0x299   : > { %3375 = vmatmul.msk.bf16.gmra.mxu2 %vm635_vm1, %v4290_v18 }
 0x29a   : > { %3395 = vmatmul.msk.bf16.gmra.mxu3 %vm635_vm1, %v4940_v8 }
 0x29c   : > { %v1719_v17 = vpop.f32.mrf.mxu2 }
 0x29d   : > { %v1784_v35 = vadd.f32 %v1719_v17, %v1558_v7  ;;  %v1945_v32 = vpop.f32.mrf.mxu3  ;;  %v1495_v28 = vpop.f32.mrf.mxu1  ;;  %v2064_v7 = vld [vmem:[#allocation2 + $0x22f] sm:$0xff] }
 0x29e   : > { %v1559_v34 = vadd.f32 %v1495_v28, %v4941_v27 }
 0x29f   : > { %v4502_v54 = vadd.f32 %v1945_v32, %v1784_v35  ;;  %v2080_v32 = vpack.c.bf16 %v2064_v7, %v2063_v57  ;;  %v2261_v7 = vld [vmem:[#allocation2 + $0x68] sm:$0xff] }
 0x2a4   : > { %3415 = vmatmul.msk.bf16.gmra.mxu0 %vm635_vm1, %v4313_v45  ;;  %v1721_v44 = vpop.f32.mrf.mxu2 }
 0x2a5   : > { %v4507_v51 = vadd.f32 %v1721_v44, %v1559_v34  ;;  %v4509_v22 = vpop.f32.mrf.mxu3  ;;  %v1498_v18 = vpop.f32.mrf.mxu1  ;;  %v2260_v44 = vld [vmem:[#allocation2 + $0x50] sm:$0xff] }
 0x2a6   : > { %v1560_v30 = vadd.f32 %v1498_v18, %v4942_v37  ;;  %v2485_v18 = vld [vmem:[#allocation2 + $0x49] sm:$0xff]  ;;  %v2486_v37 = vld [vmem:[#allocation2 + $0x51] sm:$0xff] }
 0x2a8   : > { %3356 = vmatmul.msk.bf16.gmra.mxu1 %vm635_vm1, %v4313_v45 }
 0x2a9   : > { %3376 = vmatmul.msk.bf16.gmra.mxu2 %vm635_vm1, %v4311_v59 }
 0x2aa   : > { %3396 = vmatmul.msk.bf16.gmra.mxu3 %vm635_vm1, %v4943_v52 }
 0x2ac   : > { %v1724_v60 = vpop.f32.mrf.mxu2 }
 0x2ad   : > { %v1786_v38 = vadd.f32 %v1724_v60, %v1560_v30  ;;  %v1950_v15 = vpop.f32.mrf.mxu3  ;;  %v1500_v46 = vpop.f32.mrf.mxu1 }
 0x2ae   : > { %v1561_v62 = vadd.f32 %v1500_v46, %v4944_v9 }
 0x2af   : > { %v4518_v10 = vadd.f32 %v1950_v15, %v1786_v38  ;;  %v2291_v38 = vpack.c.bf16 %v2260_v44, %v2259_v12  ;;  %v2517_v15 = vpack.c.bf16 %v2486_v37, %v2485_v18  ;;  %v4947_v37 = vld [vmem:[#allocation19_spill] sm:$0xff] }
 0x2b4   : > { %3416 = vmatmul.msk.bf16.gmra.mxu0 %vm635_vm1, %v2079_v21  ;;  %v1726_v45 = vpop.f32.mrf.mxu2 }
 0x2b5   : > { %v4522_v59 = vadd.f32 %v1726_v45, %v1561_v62  ;;  %v4524_v16 = vpop.f32.mrf.mxu3  ;;  %v1503_v56 = vpop.f32.mrf.mxu1  ;;  %v4945_v45 = vld [vmem:[#allocation17_spill] sm:$0xff] }
 0x2b6   : > { %v1562_v29 = vadd.f32 %v1503_v56, %v4327_v13  ;;  %v2488_v56 = vld [vmem:[#allocation2 + $0x71] sm:$0xff] }
 0x2b8   : > { %3357 = vmatmul.msk.bf16.gmra.mxu1 %vm635_vm1, %v2079_v21 }
 0x2b9   : > { %3377 = vmatmul.msk.bf16.gmra.mxu2 %vm635_vm1, %v4527_v1 }
 0x2ba   : > { %3397 = vmatmul.msk.bf16.gmra.mxu3 %vm635_vm1, %v4529_v41 }
 0x2bc   : > { %v1729_v8 = vpop.f32.mrf.mxu2 }
 0x2bd   : > { %v1788_v17 = vadd.f32 %v1729_v8, %v1562_v29  ;;  %v1955_v35 = vpop.f32.mrf.mxu3  ;;  %v1505_v28 = vpop.f32.mrf.mxu1  ;;  %v4946_v8 = vld [vmem:[#allocation18_spill] sm:$0xff] }
 0x2be   : > { %v1563_v27 = vadd.f32 %v1505_v28, %v4330_v0 }
 0x2bf   : > { %v4536_v13 = vadd.f32 %v1955_v35, %v1788_v17  ;;  %v2292_v35 = vpack.c.bf16 %v2262_v31, %v2261_v7 }
 0x2c4   : > { %3417 = vmatmul.msk.bf16.gmra.mxu0 %vm635_vm1, %v2080_v32  ;;  %v1731_v34 = vpop.f32.mrf.mxu2  ;;  %v2518_v32 = vpack.c.bf16 %v2488_v56, %v2487_v58 }
 0x2c5   : > { %v4540_v30 = vadd.f32 %v1731_v34, %v1563_v27  ;;  %v4542_v52 = vpop.f32.mrf.mxu3  ;;  %v1508_v60 = vpop.f32.mrf.mxu1 }
 0x2c6   : > { %v1564_v14 = vadd.f32 %v1508_v60, %v4337_v33 }
 0x2c8   : > { %3422 = vmatmul.msk.bf16.vlgmr.msra.gmra.mxu1 %vm635_vm1, %v2291_v38  ;;  %v2489_v38 = vld [vmem:[#allocation2 + $0x89] sm:$0xff] }
 0x2c9   : > { %3442 = vmatmul.msk.bf16.vlgmr.msra.gmra.mxu2 %vm635_vm1, %v2517_v15  ;;  %v2490_v15 = vld [vmem:[#allocation2 + $0x91] sm:$0xff] }
 0x2cc   : > { %v1734_v0 = vpop.f32.mrf.mxu2 }
 0x2cd   : > { %v1790_v46 = vadd.f32 %v1734_v0, %v1564_v14  ;;  %v1960_v9 = vpop.f32.mrf.mxu3  ;;  %v1510_v62 = vpop.f32.mrf.mxu1  ;;  %v2264_v14 = vld [vmem:[#allocation2 + $0x90] sm:$0xff] }
 0x2ce   : > { %v1565_v61 = vadd.f32 %v1510_v62, %v4945_v45  ;;  %v2263_v62 = vld [vmem:[#allocation2 + $0x88] sm:$0xff] }
 0x2cf   : > { %v4547_v21 = vadd.f32 %v1960_v9, %v1790_v46 }
 0x2d4   : > { %v1736_v49 = vpop.f32.mrf.mxu2 }
 0x2d5   : > { %v4550_v29 = vadd.f32 %v1736_v49, %v1565_v61  ;;  %v4552_v33 = vpop.f32.mrf.mxu3  ;;  %v1513_v57 = vpop.f32.mrf.mxu1  ;;  %v2293_v61 = vpack.c.bf16 %v2264_v14, %v2263_v62  ;;  %v2519_v49 = vpack.c.bf16 %v2490_v15, %v2489_v38 }
 0x2d6   : > { %v1566_v17 = vadd.f32 %v1513_v57, %v4946_v8 }
 0x2d8   : > { %3423 = vmatmul.msk.bf16.gmra.mxu1 %vm635_vm1, %v2292_v35  ;;  %v2266_v35 = vld [vmem:[#allocation2 + $0xb0] sm:$0xff] }
 0x2d9   : > { %3443 = vmatmul.msk.bf16.gmra.mxu2 %vm635_vm1, %v2518_v32  ;;  %v2491_v32 = vld [vmem:[#allocation2 + $0xa9] sm:$0xff] }
 0x2dc   : > { %v1739_v28 = vpop.f32.mrf.mxu2 }
 0x2dd   : > { %v1792_v27 = vadd.f32 %v1739_v28, %v1566_v17  ;;  %v1965_v34 = vpop.f32.mrf.mxu3  ;;  %v1515_v44 = vpop.f32.mrf.mxu1  ;;  %v2492_v28 = vld [vmem:[#allocation2 + $0xb1] sm:$0xff] }
 0x2de   : > { %v1567_v60 = vadd.f32 %v1515_v44, %v4947_v37  ;;  %v2265_v44 = vld [vmem:[#allocation2 + $0xa8] sm:$0xff] }
 0x2df   : > { %v4557_v18 = vadd.f32 %v1965_v34, %v1792_v27 }
 0x2e4   : > { %v1741_v12 = vpop.f32.mrf.mxu2 }
 0x2e5   : > { %v4560_v0 = vadd.f32 %v1741_v12, %v1567_v60  ;;  %v4562_v46 = vpop.f32.mrf.mxu3  ;;  %v1518_v9 = vpop.f32.mrf.mxu1  ;;  %v2294_v60 = vpack.c.bf16 %v2266_v35, %v2265_v44  ;;  %v2520_v12 = vpack.c.bf16 %v2492_v28, %v2491_v32 }
 0x2e6   : > { %v1568_v45 = vadd.f32 %v1518_v9, %v4360_v11 }
 0x2e8   : > { %3424 = vmatmul.msk.bf16.gmra.mxu1 %vm635_vm1, %v2293_v61  ;;  %v2268_v61 = vld [vmem:[#allocation2 + $0xd0] sm:$0xff] }
 0x2e9   : > { %3444 = vmatmul.msk.bf16.gmra.mxu2 %vm635_vm1, %v2519_v49  ;;  %v2493_v49 = vld [vmem:[#allocation2 + $0xc9] sm:$0xff] }
 0x2ec   : > { %v1744_v31 = vpop.f32.mrf.mxu2 }
 0x2ed   : > { %v1794_v58 = vadd.f32 %v1744_v31, %v1568_v45  ;;  %v1970_v56 = vpop.f32.mrf.mxu3  ;;  %v1520_v57 = vpop.f32.mrf.mxu1  ;;  %v2494_v31 = vld [vmem:[#allocation2 + $0xd1] sm:$0xff] }
 0x2ee   : > { %v1569_v8 = vadd.f32 %v1520_v57, %v4364_v50  ;;  %v2267_v57 = vld [vmem:[#allocation2 + $0xc8] sm:$0xff]  ;;  %v2521_v35 = vpack.c.bf16 %v2494_v31, %v2493_v49 }
 0x2ef   : > { %v4567_v7 = vadd.f32 %v1970_v56, %v1794_v58 }
 0x2f4   : > { %v1746_v17 = vpop.f32.mrf.mxu2 }
 0x2f5   : > { %v4570_v27 = vadd.f32 %v1746_v17, %v1569_v8  ;;  %v4572_v11 = vpop.f32.mrf.mxu3  ;;  %v1523_v34 = vpop.f32.mrf.mxu1  ;;  %v2295_v17 = vpack.c.bf16 %v2268_v61, %v2267_v57 }
 0x2f6   : > { %v1570_v37 = vadd.f32 %v1523_v34, %v4372_v53 }
 0x2f8   : > { %3425 = vmatmul.msk.bf16.gmra.mxu1 %vm635_vm1, %v2294_v60 }
 0x2f9   : > { %3445 = vmatmul.msk.bf16.gmra.mxu2 %vm635_vm1, %v2520_v12  ;;  %v2270_v12 = vld [vmem:[#allocation2 + $0xf0] sm:$0xff] }
 0x2fc   : > { %v1749_v14 = vpop.f32.mrf.mxu2 }
 0x2fd   : > { %v1796_v50 = vadd.f32 %v1749_v14, %v1570_v37  ;;  %v1975_v38 = vpop.f32.mrf.mxu3  ;;  %v1525_v15 = vpop.f32.mrf.mxu1  ;;  %v2495_v14 = vld [vmem:[#allocation2 + $0xe9] sm:$0xff] }
 0x2fe   : > { %v1571_v62 = vadd.f32 %v1525_v15, %v4376_v2 }
 0x2ff   : > { %v4577_v9 = vadd.f32 %v1975_v38, %v1796_v50  ;;  %v2496_v50 = vld [vmem:[#allocation2 + $0xf1] sm:$0xff] }
 0x300   : > { %v2522_v49 = vpack.c.bf16 %v2496_v50, %v2495_v14 }
 0x304   : > { %v1751_v45 = vpop.f32.mrf.mxu2 }
 0x305   : > { %v4580_v58 = vadd.f32 %v1751_v45, %v1571_v62  ;;  %v4582_v53 = vpop.f32.mrf.mxu3  ;;  %v1528_v56 = vpop.f32.mrf.mxu1  ;;  %v2269_v62 = vld [vmem:[#allocation2 + $0xe8] sm:$0xff] }
 0x306   : > { %v1572_v8 = vadd.f32 %v1528_v56, %v4384_v40  ;;  %v2296_v61 = vpack.c.bf16 %v2270_v12, %v2269_v62 }
 0x308   : > { %3426 = vmatmul.msk.bf16.gmra.mxu1 %vm635_vm1, %v2295_v17 }
 0x309   : > { %3446 = vmatmul.msk.bf16.gmra.mxu2 %vm635_vm1, %v2521_v35 }
 0x30c   : > { %v1754_v32 = vpop.f32.mrf.mxu2 }
 0x30d   : > { %v1798_v2 = vadd.f32 %v1754_v32, %v1572_v8  ;;  %v1980_v28 = vpop.f32.mrf.mxu3  ;;  %v1530_v34 = vpop.f32.mrf.mxu1  ;;  %v2272_v32 = vld [vmem:[#allocation2 + $0x110] sm:$0xff] }
 0x30e   : > { %v1573_v37 = vadd.f32 %v1530_v34, %v4388_v19 }
 0x30f   : > { %v4587_v44 = vadd.f32 %v1980_v28, %v1798_v2  ;;  %v2497_v2 = vld [vmem:[#allocation2 + $0x109] sm:$0xff]  ;;  %v2498_v28 = vld [vmem:[#allocation2 + $0x111] sm:$0xff] }
 0x310   : > { %v2523_v50 = vpack.c.bf16 %v2498_v28, %v2497_v2 }
 0x314   : > { %v1756_v60 = vpop.f32.mrf.mxu2 }
 0x315   : > { %v4590_v38 = vadd.f32 %v1756_v60, %v1573_v37  ;;  %v4592_v40 = vpop.f32.mrf.mxu3  ;;  %v1533_v15 = vpop.f32.mrf.mxu1  ;;  %v2271_v60 = vld [vmem:[#allocation2 + $0x108] sm:$0xff] }
 0x316   : > { %v1574_v45 = vadd.f32 %v1533_v15, %v4396_v4  ;;  %v2297_v14 = vpack.c.bf16 %v2272_v32, %v2271_v60  ;;  %v2273_v32 = vld [vmem:[#allocation2 + $0x128] sm:$0xff] }
 0x318   : > { %3427 = vmatmul.msk.bf16.gmra.mxu1 %vm635_vm1, %v2296_v61 }
 0x319   : > { %3447 = vmatmul.msk.bf16.gmra.mxu2 %vm635_vm1, %v2522_v49 }
 0x31c   : > { %v1759_v31 = vpop.f32.mrf.mxu2 }
 0x31d   : > { %v1800_v19 = vadd.f32 %v1759_v31, %v1574_v45  ;;  %v1985_v56 = vpop.f32.mrf.mxu3  ;;  %v1535_v57 = vpop.f32.mrf.mxu1 }
 0x31e   : > { %v1575_v17 = vadd.f32 %v1535_v57, %v4400_v36  ;;  %v2500_v57 = vld [vmem:[#allocation2 + $0x131] sm:$0xff] }
 0x31f   : > { %v4597_v8 = vadd.f32 %v1985_v56, %v1800_v19  ;;  %v2274_v19 = vld [vmem:[#allocation2 + $0x130] sm:$0xff] }
 0x320   : > { %v2499_v56 = vld [vmem:[#allocation2 + $0x129] sm:$0xff]  ;;  %v2298_v28 = vpack.c.bf16 %v2274_v19, %v2273_v32 }
 0x321   : > { %v2275_v19 = vld [vmem:[#allocation2 + $0x148] sm:$0xff] }
 0x324   : > { %v1761_v35 = vpop.f32.mrf.mxu2 }
 0x325   : > { %v4600_v34 = vadd.f32 %v1761_v35, %v1575_v17  ;;  %v4602_v4 = vpop.f32.mrf.mxu3  ;;  %v1538_v37 = vpop.f32.mrf.mxu1 }
 0x326   : > { %v1576_v12 = vadd.f32 %v1538_v37, %v4408_v25  ;;  %v2524_v37 = vpack.c.bf16 %v2500_v57, %v2499_v56 }
 0x328   : > { %3428 = vmatmul.msk.bf16.gmra.mxu1 %vm635_vm1, %v2297_v14 }
 0x329   : > { %3448 = vmatmul.msk.bf16.gmra.mxu2 %vm635_vm1, %v2523_v50 }
 0x32c   : > { %v1764_v15 = vpop.f32.mrf.mxu2 }
 0x32d   : > { %v1802_v36 = vadd.f32 %v1764_v15, %v1576_v12  ;;  %v1990_v62 = vpop.f32.mrf.mxu3  ;;  %v1540_v45 = vpop.f32.mrf.mxu1 }
 0x32e   : > { %v1577_v49 = vadd.f32 %v1540_v45, %v4412_v55  ;;  %v2501_v45 = vld [vmem:[#allocation2 + $0x149] sm:$0xff] }
 0x32f   : > { %v4607_v61 = vadd.f32 %v1990_v62, %v1802_v36  ;;  %v2276_v62 = vld [vmem:[#allocation2 + $0x150] sm:$0xff] }
 0x330   : > { %v2299_v56 = vpack.c.bf16 %v2276_v62, %v2275_v19  ;;  %v4633_v19 = vpop.f32.mrf.mxu0 }
 0x334   : > { %v1766_v31 = vpop.f32.mrf.mxu2 }
 0x335   : > { %v4610_v17 = vadd.f32 %v1766_v31, %v1577_v49  ;;  %v4612_v25 = vpop.f32.mrf.mxu3  ;;  %v1543_v35 = vpop.f32.mrf.mxu1  ;;  %v2502_v49 = vld [vmem:[#allocation2 + $0x151] sm:$0xff] }
 0x336   : > { %v1578_v2 = vadd.f32 %v1543_v35, %v4420_v24  ;;  %v2525_v57 = vpack.c.bf16 %v2502_v49, %v2501_v45  ;;  %v2277_v45 = vld [vmem:[#allocation2 + $0x168] sm:$0xff] }
 0x338   : > { %3429 = vmatmul.msk.bf16.gmra.mxu1 %vm635_vm1, %v2298_v28 }
 0x339   : > { %3449 = vmatmul.msk.bf16.gmra.mxu2 %vm635_vm1, %v2524_v37 }
 0x33c   : > { %v1769_v60 = vpop.f32.mrf.mxu2 }
 0x33d   : > { %v1804_v55 = vadd.f32 %v1769_v60, %v1578_v2  ;;  %v1995_v12 = vpop.f32.mrf.mxu3  ;;  %v1545_v14 = vpop.f32.mrf.mxu1 }
 0x33e   : > { %v1579_v15 = vadd.f32 %v1545_v14, %v4427_v47  ;;  %v4628_v47 = vld [vmem:[%s4915_s4] ss:$0 sm:$0xff]  ;;  %v2504_v14 = vld [vmem:[#allocation2 + $0x171] sm:$0xff] }
 0x33f   : > { %v4617_v50 = vadd.f32 %v1995_v12, %v1804_v55  ;;  %v2278_v55 = vld [vmem:[#allocation2 + $0x170] sm:$0xff] }
 0x340   : > { %v2503_v12 = vld [vmem:[#allocation2 + $0x169] sm:$0xff] }
 0x344   : > { %v1771_v36 = vpop.f32.mrf.mxu2 }
 0x345   : > { %v4620_v31 = vadd.f32 %v1771_v36, %v1579_v15  ;;  %v2373_v24 = vpop.f32.mrf.mxu1 }
 0x346   : > { %v2453_v2 = vadd.f32 %v2373_v24, %v4435_v26  ;;  %v2300_v26 = vpack.c.bf16 %v2278_v55, %v2277_v45  ;;  %v2526_v24 = vpack.c.bf16 %v2504_v14, %v2503_v12  ;;  %v2280_v12 = vld [vmem:[#allocation2 + $0x190] sm:$0xff] }
 0x347   : > { %v2505_v14 = vld [vmem:[#allocation2 + $0x189] sm:$0xff] }
 0x348   : > { %3430 = vmatmul.msk.bf16.gmra.mxu1 %vm635_vm1, %v2299_v56 }
 0x349   : > { %3450 = vmatmul.msk.bf16.gmra.mxu2 %vm635_vm1, %v2525_v57 }
 0x34c   : > { %v2599_v35 = vpop.f32.mrf.mxu2 }
 0x34d   : > { %v2375_v32 = vpop.f32.mrf.mxu1  ;;  %v2679_v28 = vadd.f32 %v2599_v35, %v2453_v2 }
 0x34e   : > { %v2454_v37 = vadd.f32 %v2375_v32, %v4443_v39 }
 0x34f   : > { %v2715_v15 = vadd.f32 %v4628_v47, %v2679_v28 }
 0x351   : > { %v2747_v56 = vmax.f32 %v2715_v15, 0.0  ;;  %v2506_v15 = vld [vmem:[#allocation2 + $0x191] sm:$0xff] }
 0x354   : > { %v2601_v60 = vpop.f32.mrf.mxu2 }
 0x355   : > { %v2680_v36 = vadd.f32 %v2601_v60, %v2454_v37  ;;  %v2378_v62 = vpop.f32.mrf.mxu1  ;;  %v4639_v37 = vpop.f32.mrf.mxu0 }
 0x356   : > { %v2455_v2 = vadd.f32 %v2378_v62, %v4447_v20 }
 0x357   : > { %v2716_v49 = vadd.f32 %v4628_v47, %v2680_v36 }
 0x358   : > { %3431 = vmatmul.msk.bf16.gmra.mxu1 %vm635_vm1, %v2300_v26  ;;  %v2279_v26 = vld [vmem:[#allocation2 + $0x188] sm:$0xff] }
 0x359   : > { %v2748_v57 = vmax.f32 %v2716_v49, 0.0  ;;  %3451 = vmatmul.msk.bf16.gmra.mxu2 %vm635_vm1, %v2526_v24 }
 0x35b   : > { %v2779_v39 = vpack.c.bf16 %v2748_v57, %v2747_v56  ;;  %v2301_v56 = vpack.c.bf16 %v2280_v12, %v2279_v26  ;;  %v2527_v57 = vpack.c.bf16 %v2506_v15, %v2505_v14  ;;  %v2282_v12 = vld [vmem:[#allocation2 + $0x1b0] sm:$0xff] }
 0x35c   : > { %v2604_v35 = vpop.f32.mrf.mxu2  ;;  %v2507_v14 = vld [vmem:[#allocation2 + $0x1a9] sm:$0xff]  ;;  %v2508_v15 = vld [vmem:[#allocation2 + $0x1b1] sm:$0xff] }
 0x35d   : > { %3462 = vmatmul.msk.bf16.vlgmr.msra.gmra.mxu3 %vm635_vm1, %v2779_v39  ;;  %v2380_v32 = vpop.f32.mrf.mxu1  ;;  %v2681_v28 = vadd.f32 %v2604_v35, %v2455_v2  ;;  %v4646_v62 = vpop.f32.mrf.mxu0 }
 0x35e   : > { %v2456_v60 = vadd.f32 %v2380_v32, %v4455_v63 }
 0x35f   : > { %v2717_v36 = vadd.f32 %v4628_v47, %v2681_v28 }
 0x361   : > { %v2749_v39 = vmax.f32 %v2717_v36, 0.0 }
 0x364   : > { %v2606_v55 = vpop.f32.mrf.mxu2 }
 0x365   : > { %v2682_v45 = vadd.f32 %v2606_v55, %v2456_v60  ;;  %v2383_v49 = vpop.f32.mrf.mxu1  ;;  %v4652_v26 = vpop.f32.mrf.mxu0 }
 0x366   : > { %v2457_v2 = vadd.f32 %v2383_v49, %v4459_v43 }
 0x367   : > { %v2718_v24 = vadd.f32 %v4628_v47, %v2682_v45 }
 0x368   : > { %3432 = vmatmul.msk.bf16.gmra.mxu1 %vm635_vm1, %v2301_v56  ;;  %v2281_v56 = vld [vmem:[#allocation2 + $0x1a8] sm:$0xff] }
 0x369   : > { %v2750_v20 = vmax.f32 %v2718_v24, 0.0  ;;  %3452 = vmatmul.msk.bf16.gmra.mxu2 %vm635_vm1, %v2527_v57 }
 0x36b   : > { %v2780_v63 = vpack.c.bf16 %v2750_v20, %v2749_v39  ;;  %v2302_v39 = vpack.c.bf16 %v2282_v12, %v2281_v56  ;;  %v2528_v20 = vpack.c.bf16 %v2508_v15, %v2507_v14  ;;  %v2284_v12 = vld [vmem:[#allocation2 + $0x1d0] sm:$0xff] }
 0x36c   : > { %v2609_v35 = vpop.f32.mrf.mxu2  ;;  %v2509_v14 = vld [vmem:[#allocation2 + $0x1c9] sm:$0xff]  ;;  %v2510_v15 = vld [vmem:[#allocation2 + $0x1d1] sm:$0xff] }
 0x36d   : > { %3463 = vmatmul.msk.bf16.gmra.mxu3 %vm635_vm1, %v2780_v63  ;;  %v2385_v32 = vpop.f32.mrf.mxu1  ;;  %v2683_v28 = vadd.f32 %v2609_v35, %v2457_v2  ;;  %v4659_v2 = vpop.f32.mrf.mxu0 }
 0x36e   : > { %v2458_v60 = vadd.f32 %v2385_v32, %v4468_v42 }
 0x36f   : > { %v2719_v36 = vadd.f32 %v4628_v47, %v2683_v28 }
 0x371   : > { %v2751_v63 = vmax.f32 %v2719_v36, 0.0 }
 0x374   : > { %v2611_v55 = vpop.f32.mrf.mxu2 }
 0x375   : > { %v2684_v45 = vadd.f32 %v2611_v55, %v2458_v60  ;;  %v2388_v24 = vpop.f32.mrf.mxu1 }
 0x376   : > { %v2459_v32 = vadd.f32 %v2388_v24, %v4473_v48 }
 0x377   : > { %v2720_v57 = vadd.f32 %v4628_v47, %v2684_v45 }
 0x378   : > { %3433 = vmatmul.msk.bf16.gmra.mxu1 %vm635_vm1, %v2302_v39 }
 0x379   : > { %v2752_v43 = vmax.f32 %v2720_v57, 0.0  ;;  %3453 = vmatmul.msk.bf16.gmra.mxu2 %vm635_vm1, %v2528_v20  ;;  %v2283_v57 = vld [vmem:[#allocation2 + $0x1c8] sm:$0xff] }
 0x37a   : > { %v2303_v20 = vpack.c.bf16 %v2284_v12, %v2283_v57  ;;  %v2512_v57 = vld [vmem:[#allocation2 + $0x1f1] sm:$0xff] }
 0x37b   : > { %v2781_v42 = vpack.c.bf16 %v2752_v43, %v2751_v63  ;;  %v2529_v63 = vpack.c.bf16 %v2510_v15, %v2509_v14 }
 0x37c   : > { %v2614_v49 = vpop.f32.mrf.mxu2 }
 0x37d   : > { %3464 = vmatmul.msk.bf16.gmra.mxu3 %vm635_vm1, %v2781_v42  ;;  %v2390_v35 = vpop.f32.mrf.mxu1  ;;  %v2685_v28 = vadd.f32 %v2614_v49, %v2459_v32  ;;  %v2235_v49 = vadd.f32 %v4633_v19, %v4486_v3  ;;  %v2009_v32 = vadd.f32 %v4493_v5, %v4491_v6 }
 0x37e   : > { %v2460_v60 = vadd.f32 %v2390_v35, %v4482_v23  ;;  %v2179_v23 = vpop.f32.mrf.mxu0 }
 0x37f   : > { %v2721_v36 = vadd.f32 %v4628_v47, %v2685_v28 }
 0x381   : > { %v2753_v43 = vmax.f32 %v2721_v36, 0.0  ;;  %v2286_v36 = vld [vmem:[#allocation2 + $0x1f0] sm:$0xff] }
 0x384   : > { %v2616_v55 = vpop.f32.mrf.mxu2 }
 0x385   : > { %v2686_v45 = vadd.f32 %v2616_v55, %v2460_v60  ;;  %v2393_v56 = vpop.f32.mrf.mxu1  ;;  %v2236_v60 = vadd.f32 %v4639_v37, %v2009_v32 }
 0x386   : > { %v2461_v28 = vadd.f32 %v2393_v56, %v2235_v49  ;;  %v4672_v14 = vpop.f32.mrf.mxu0 }
 0x387   : > { %v2722_v39 = vadd.f32 %v4628_v47, %v2686_v45  ;;  %v2511_v45 = vld [vmem:[#allocation2 + $0x1e9] sm:$0xff] }
 0x388   : > { %3434 = vmatmul.msk.bf16.gmra.mxu1 %vm635_vm1, %v2303_v20  ;;  %v2285_v20 = vld [vmem:[#allocation2 + $0x1e8] sm:$0xff]  ;;  %v2530_v6 = vpack.c.bf16 %v2512_v57, %v2511_v45 }
 0x389   : > { %v2754_v48 = vmax.f32 %v2722_v39, 0.0  ;;  %3454 = vmatmul.msk.bf16.gmra.mxu2 %vm635_vm1, %v2529_v63 }
 0x38b   : > { %v2782_v24 = vpack.c.bf16 %v2754_v48, %v2753_v43  ;;  %v2304_v43 = vpack.c.bf16 %v2286_v36, %v2285_v20 }
 0x38c   : > { %v2619_v42 = vpop.f32.mrf.mxu2 }
 0x38d   : > { %3465 = vmatmul.msk.bf16.gmra.mxu3 %vm635_vm1, %v2782_v24  ;;  %v2395_v35 = vpop.f32.mrf.mxu1  ;;  %v2687_v55 = vadd.f32 %v2619_v42, %v2461_v28  ;;  %v2237_v24 = vadd.f32 %v4646_v62, %v4502_v54 }
 0x38e   : > { %v2462_v12 = vadd.f32 %v2395_v35, %v2236_v60  ;;  %v2184_v42 = vpop.f32.mrf.mxu0  ;;  %v2011_v35 = vadd.f32 %v4509_v22, %v4507_v51 }
 0x38f   : > { %v2723_v39 = vadd.f32 %v4628_v47, %v2687_v55 }
 0x390   : > { %v2238_v28 = vadd.f32 %v4652_v26, %v2011_v35  ;;  %v2239_v26 = vadd.f32 %v4659_v2, %v4518_v10 }
 0x391   : > { %v2755_v5 = vmax.f32 %v2723_v39, 0.0 }
 0x394   : > { %v2621_v15 = vpop.f32.mrf.mxu2 }
 0x395   : > { %v2688_v3 = vadd.f32 %v2621_v15, %v2462_v12  ;;  %v2398_v19 = vpop.f32.mrf.mxu1 }
 0x396   : > { %v2463_v32 = vadd.f32 %v2398_v19, %v2237_v24  ;;  %v2187_v54 = vpop.f32.mrf.mxu0  ;;  %v2013_v19 = vadd.f32 %v4524_v16, %v4522_v59 }
 0x397   : > { %v2724_v63 = vadd.f32 %v4628_v47, %v2688_v3 }
 0x398   : > { %3435 = vmatmul.msk.bf16.gmra.mxu1 %vm635_vm1, %v2304_v43 }
 0x399   : > { %v2756_v56 = vmax.f32 %v2724_v63, 0.0  ;;  %3455 = vmatmul.msk.bf16.gmra.mxu2 %vm635_vm1, %v2530_v6  ;;  %v2240_v63 = vadd.f32 %v2179_v23, %v2013_v19  ;;  %v2289_v6 = vld [vmem:[#allocation2 + $0x228] sm:$0xff] }
 0x39b   : > { %v2783_v37 = vpack.c.bf16 %v2756_v56, %v2755_v5  ;;  %v2515_v56 = vld [vmem:[#allocation2 + $0x229] sm:$0xff] }
 0x39c   : > { %v2624_v48 = vpop.f32.mrf.mxu2 }
 0x39d   : > { %3466 = vmatmul.msk.bf16.gmra.mxu3 %vm635_vm1, %v2783_v37  ;;  %v2400_v49 = vpop.f32.mrf.mxu1  ;;  %v2689_v60 = vadd.f32 %v2624_v48, %v2463_v32  ;;  %v2516_v37 = vld [vmem:[#allocation2 + $0x231] sm:$0xff] }
 0x39e   : > { %v2464_v55 = vadd.f32 %v2400_v49, %v2238_v28  ;;  %v2189_v5 = vpop.f32.mrf.mxu0  ;;  %v2532_v2 = vpack.c.bf16 %v2516_v37, %v2515_v56 }
 0x39f   : > { %v2725_v15 = vadd.f32 %v4628_v47, %v2689_v60 }
 0x3a1   : > { %v2757_v62 = vmax.f32 %v2725_v15, 0.0  ;;  %v2015_v15 = vadd.f32 %v4542_v52, %v4540_v30  ;;  %v2017_v52 = vadd.f32 %v4552_v33, %v4550_v29 }
 0x3a4   : > { %v2626_v12 = vpop.f32.mrf.mxu2 }
 0x3a5   : > { %v2690_v36 = vadd.f32 %v2626_v12, %v2464_v55  ;;  %v2403_v45 = vpop.f32.mrf.mxu1  ;;  %v2241_v55 = vadd.f32 %v4672_v14, %v4536_v13 }
 0x3a6   : > { %v2465_v20 = vadd.f32 %v2403_v45, %v2239_v26  ;;  %v2192_v23 = vpop.f32.mrf.mxu0  ;;  %v2242_v45 = vadd.f32 %v2184_v42, %v2015_v15 }
 0x3a7   : > { %v2726_v57 = vadd.f32 %v4628_v47, %v2690_v36 }
 0x3a8   : > { %3436 = vmatmul.msk.bf16.gmra.mxu1 %vm635_vm1, %v4527_v1  ;;  %v2290_v1 = vld [vmem:[#allocation2 + $0x230] sm:$0xff] }
 0x3a9   : > { %v2758_v39 = vmax.f32 %v2726_v57, 0.0  ;;  %3456 = vmatmul.msk.bf16.gmra.mxu2 %vm635_vm1, %v4529_v41  ;;  %v2306_v10 = vpack.c.bf16 %v2290_v1, %v2289_v6  ;;  %v2244_v1 = vadd.f32 %v2189_v5, %v2017_v52  ;;  %v2245_v5 = vadd.f32 %v2192_v23, %v4557_v18 }
 0x3ab   : > { %v2784_v51 = vpack.c.bf16 %v2758_v39, %v2757_v62 }
 0x3ac   : > { %v2629_v22 = vpop.f32.mrf.mxu2 }
 0x3ad   : > { %3467 = vmatmul.msk.bf16.gmra.mxu3 %vm635_vm1, %v2784_v51  ;;  %v2405_v3 = vpop.f32.mrf.mxu1  ;;  %v2691_v43 = vadd.f32 %v2629_v22, %v2465_v20 }
 0x3ae   : > { %v2466_v41 = vadd.f32 %v2405_v3, %v2240_v63  ;;  %v2194_v26 = vpop.f32.mrf.mxu0 }
 0x3af   : > { %v2727_v24 = vadd.f32 %v4628_v47, %v2691_v43  ;;  %v2243_v43 = vadd.f32 %v2187_v54, %v4547_v21  ;;  %v4712_v21 = vpop.f32.mrf.mxu3 }
 0x3b1   : > { %v2759_v28 = vmax.f32 %v2727_v24, 0.0 }
 0x3b4   : > { %v2631_v48 = vpop.f32.mrf.mxu2 }
 0x3b5   : > { %v2692_v49 = vadd.f32 %v2631_v48, %v2466_v41  ;;  %v2408_v35 = vpop.f32.mrf.mxu1 }
 0x3b6   : > { %v2467_v36 = vadd.f32 %v2408_v35, %v2241_v55  ;;  %v2197_v6 = vpop.f32.mrf.mxu0 }
 0x3b7   : > { %v2728_v32 = vadd.f32 %v4628_v47, %v2692_v49  ;;  %v2247_v52 = vadd.f32 %v2197_v6, %v4567_v7 }
 0x3b8   : > { %3437 = vmatmul.msk.bf16.gmra.mxu1 %vm635_vm1, %v2306_v10 }
 0x3b9   : > { %v2760_v59 = vmax.f32 %v2728_v32, 0.0  ;;  %3457 = vmatmul.msk.bf16.gmra.mxu2 %vm635_vm1, %v2532_v2  ;;  %v317_v32 = vld [vmem:[%s3864_s9] sm:$0xff]  }
 0x3ba   : > { %v2944_v55 = vunpack.c.l.bf16 %v317_v32 }
 0x3bb   : > { %v2785_v16 = vpack.c.bf16 %v2760_v59, %v2759_v28  ;;  %v4720_v28 = vld [vmem:[%s4917_s6] ss:$0 sm:$0xff] }
 0x3bc   : > { %v2634_v60 = vpop.f32.mrf.mxu2 }
 0x3bd   : > { %3468 = vmatmul.msk.bf16.gmra.mxu3 %vm635_vm1, %v2785_v16  ;;  %v2410_v12 = vpop.f32.mrf.mxu1  ;;  %v2693_v57 = vadd.f32 %v2634_v60, %v2467_v36  ;;  %v2019_v16 = vadd.f32 %v4562_v46, %v4560_v0  ;;  %v2945_v46 = vunpack.c.h.bf16 %v317_v32 }
 0x3be   : > { %v2468_v62 = vadd.f32 %v2410_v12, %v2242_v45  ;;  %v2199_v35 = vpop.f32.mrf.mxu0 }
 0x3bf   : > { %v2729_v51 = vadd.f32 %v4628_v47, %v2693_v57  ;;  %v2246_v15 = vadd.f32 %v2194_v26, %v2019_v16 }
 0x3c1   : > { %v2761_v20 = vmax.f32 %v2729_v51, 0.0 }
 0x3c4   : > { %v2636_v39 = vpop.f32.mrf.mxu2 }
 0x3c5   : > { %v2694_v22 = vadd.f32 %v2636_v39, %v2468_v62  ;;  %v2413_v3 = vpop.f32.mrf.mxu1 }
 0x3c6   : > { %v2469_v42 = vadd.f32 %v2413_v3, %v2243_v43  ;;  %v2202_v57 = vpop.f32.mrf.mxu0 }
 0x3c7   : > { %v2730_v19 = vadd.f32 %v4628_v47, %v2694_v22 }
 0x3c9   : > { %v2762_v13 = vmax.f32 %v2730_v19, 0.0 }
 0x3cb   : > { %v2786_v14 = vpack.c.bf16 %v2762_v13, %v2761_v20 }
 0x3cc   : > { %v2639_v63 = vpop.f32.mrf.mxu2 }
 0x3cd   : > { %3469 = vmatmul.msk.bf16.gmra.mxu3 %vm635_vm1, %v2786_v14  ;;  %v2415_v30 = vpop.f32.mrf.mxu1  ;;  %v2695_v56 = vadd.f32 %v2639_v63, %v2469_v42 }
 0x3ce   : > { %v2470_v37 = vadd.f32 %v2415_v30, %v2244_v1  ;;  %v319_v30 = vld [vmem:[%s3864_s9 + $0x8] sm:$0xff]   ;;  %v2204_v1 = vpop.f32.mrf.mxu0 }
 0x3cf   : > { %v2731_v48 = vadd.f32 %v4628_v47, %v2695_v56 }
 0x3d1   : > { %v2763_v54 = vmax.f32 %v2731_v48, 0.0  ;;  %v2946_v48 = vunpack.c.l.bf16 %v319_v30 }
 0x3d4   : > { %v2641_v41 = vpop.f32.mrf.mxu2 }
 0x3d5   : > { %v2696_v24 = vadd.f32 %v2641_v41, %v2470_v37  ;;  %v2418_v49 = vpop.f32.mrf.mxu1  ;;  %v2021_v37 = vadd.f32 %v4572_v11, %v4570_v27  ;;  %v2947_v11 = vunpack.c.h.bf16 %v319_v30 }
 0x3d6   : > { %v2471_v60 = vadd.f32 %v2418_v49, %v2245_v5 }
 0x3d7   : > { %v2732_v10 = vadd.f32 %v4628_v47, %v2696_v24  ;;  %v2248_v49 = vadd.f32 %v2199_v35, %v2021_v37 }
 0x3d9   : > { %v2764_v2 = vmax.f32 %v2732_v10, 0.0 }
 0x3db   : > { %v2787_v29 = vpack.c.bf16 %v2764_v2, %v2763_v54 }
 0x3dc   : > { %v2644_v33 = vpop.f32.mrf.mxu2 }
 0x3dd   : > { %3470 = vmatmul.msk.bf16.gmra.mxu3 %vm635_vm1, %v2787_v29  ;;  %v2420_v59 = vpop.f32.mrf.mxu1  ;;  %v2697_v36 = vadd.f32 %v2644_v33, %v2471_v60 }
 0x3de   : > { %v2472_v18 = vadd.f32 %v2420_v59, %v2246_v15  ;;  %v2207_v59 = vpop.f32.mrf.mxu0 }
 0x3df   : > { %v2733_v39 = vadd.f32 %v4628_v47, %v2697_v36 }
 0x3e0   : > { %v2864_v12 = vpop.f32.mrf.mxu3 }
 0x3e1   : > { %v2865_v45 = vadd.f32 %v4720_v28, %v2864_v12  ;;  %v2765_v19 = vmax.f32 %v2733_v39, 0.0  ;;  %v2023_v39 = vadd.f32 %v4582_v53, %v4580_v58 }
 0x3e3   : > { %v2976_v23 = vadd.f32 %v2944_v55, %v2865_v45  ;;  %v321_v45 = vld [vmem:[%s3864_s9 + $0x10] sm:$0xff]  }
 0x3e4   : > { %v2646_v62 = vpop.f32.mrf.mxu2 }
 0x3e5   : > { %v3008_v51 = vmax.f32 %v2976_v23, 0.0  ;;  %v2698_v22 = vadd.f32 %v2646_v62, %v2472_v18  ;;  %v2423_v3 = vpop.f32.mrf.mxu1  ;;  %v2249_v18 = vadd.f32 %v2202_v57, %v4577_v9 }
 0x3e6   : > { %v2473_v41 = vadd.f32 %v2423_v3, %v2247_v52 }
 0x3e7   : > { %3040 = vst.msk [vmem:[%s4727_s30] sm:$0xff] %vm465_vm0, %v3008_v51  ;;  %v2734_v0 = vadd.f32 %v4628_v47, %v2698_v22  ;;  %v2948_v22 = vunpack.c.l.bf16 %v321_v45 }
 0x3e8   : > { %v2866_v26 = vpop.f32.mrf.mxu3 }
 0x3e9   : > { %v2766_v20 = vmax.f32 %v2734_v0, 0.0  ;;  %v2867_v13 = vadd.f32 %v4720_v28, %v2866_v26  ;;  %v2250_v0 = vadd.f32 %v2204_v1, %v2023_v39  ;;  %v325_v39 = vld [vmem:[%s3864_s9 + $0x20] sm:$0xff]  }
 0x3eb   : > { %v2788_v14 = vpack.c.bf16 %v2766_v20, %v2765_v19  ;;  %v2977_v63 = vadd.f32 %v2945_v46, %v2867_v13  ;;  %v2209_v19 = vpop.f32.mrf.mxu0 }
 0x3ec   : > { %v2649_v43 = vpop.f32.mrf.mxu2 }
 0x3ed   : > { %v3009_v42 = vmax.f32 %v2977_v63, 0.0  ;;  %3471 = vmatmul.msk.bf16.gmra.mxu3 %vm635_vm1, %v2788_v14  ;;  %v2425_v56 = vpop.f32.mrf.mxu1  ;;  %v2699_v10 = vadd.f32 %v2649_v43, %v2473_v41  ;;  %v2949_v43 = vunpack.c.h.bf16 %v321_v45 }
 0x3ee   : > { %v2474_v2 = vadd.f32 %v2425_v56, %v2248_v49  ;;  %v2251_v49 = vadd.f32 %v2207_v59, %v4587_v44 }
 0x3ef   : > { %3041 = vst.msk [vmem:[%s4727_s30 + $0x8] sm:$0xff] %vm465_vm0, %v3009_v42  ;;  %v2735_v29 = vadd.f32 %v4628_v47, %v2699_v10 }
 0x3f0   : > { %v2869_v24 = vpop.f32.mrf.mxu3 }
 0x3f1   : > { %v2870_v54 = vadd.f32 %v4720_v28, %v2869_v24  ;;  %v2767_v16 = vmax.f32 %v2735_v29, 0.0  ;;  %v323_v24 = vld [vmem:[%s3864_s9 + $0x18] sm:$0xff]  }
 0x3f3   : > { %v2978_v7 = vadd.f32 %v2946_v48, %v2870_v54  ;;  %v2212_v41 = vpop.f32.mrf.mxu0 }
 0x3f4   : > { %v2651_v6 = vpop.f32.mrf.mxu2 }
 0x3f5   : > { %v3010_v33 = vmax.f32 %v2978_v7, 0.0  ;;  %v2700_v32 = vadd.f32 %v2651_v6, %v2474_v2  ;;  %v2428_v5 = vpop.f32.mrf.mxu1  ;;  %v2025_v2 = vadd.f32 %v4592_v40, %v4590_v38  ;;  %v2950_v6 = vunpack.c.l.bf16 %v323_v24 }
 0x3f6   : > { %v2475_v51 = vadd.f32 %v2428_v5, %v2249_v18 }
 0x3f7   : > { %3042 = vst.msk [vmem:[%s4727_s30 + $0x10] sm:$0xff] %vm465_vm0, %v3010_v33  ;;  %v2736_v27 = vadd.f32 %v4628_v47, %v2700_v32  ;;  %v2252_v33 = vadd.f32 %v2209_v19, %v2025_v2 }
 0x3f8   : > { %v2871_v35 = vpop.f32.mrf.mxu3 }
 0x3f9   : > { %v2768_v60 = vmax.f32 %v2736_v27, 0.0  ;;  %v2872_v55 = vadd.f32 %v4720_v28, %v2871_v35 }
 0x3fb   : > { %v2789_v12 = vpack.c.bf16 %v2768_v60, %v2767_v16  ;;  %v2979_v15 = vadd.f32 %v2947_v11, %v2872_v55  ;;  %v2214_v60 = vpop.f32.mrf.mxu0  ;;  %v2951_v55 = vunpack.c.h.bf16 %v323_v24 }
 0x3fc   : > { %v2654_v36 = vpop.f32.mrf.mxu2 }
 0x3fd   : > { %v3011_v23 = vmax.f32 %v2979_v15, 0.0  ;;  %3472 = vmatmul.msk.bf16.gmra.mxu3 %vm635_vm1, %v2789_v12  ;;  %v2430_v62 = vpop.f32.mrf.mxu1  ;;  %v2701_v46 = vadd.f32 %v2654_v36, %v2475_v51  ;;  %v2253_v51 = vadd.f32 %v2212_v41, %v4597_v8 }
 0x3fe   : > { %v2476_v20 = vadd.f32 %v2430_v62, %v2250_v0  ;;  %v2027_v0 = vadd.f32 %v4602_v4, %v4600_v34 }
 0x3ff   : > { %3043 = vst.msk [vmem:[%s4727_s30 + $0x18] sm:$0xff] %vm465_vm0, %v3011_v23  ;;  %v2737_v13 = vadd.f32 %v4628_v47, %v2701_v46 }
 0x400   : > { %v2874_v3 = vpop.f32.mrf.mxu3 }
 0x401   : > { %v2875_v26 = vadd.f32 %v4720_v28, %v2874_v3  ;;  %v2769_v52 = vmax.f32 %v2737_v13, 0.0 }
 0x403   : > { %v2980_v9 = vadd.f32 %v2948_v22, %v2875_v26  ;;  %v2952_v26 = vunpack.c.l.bf16 %v325_v39  ;;  %v2217_v19 = vpop.f32.mrf.mxu0 }
 0x404   : > { %v2656_v57 = vpop.f32.mrf.mxu2 }
 0x405   : > { %v3012_v14 = vmax.f32 %v2980_v9, 0.0  ;;  %v2702_v63 = vadd.f32 %v2656_v57, %v2476_v20  ;;  %v2433_v58 = vpop.f32.mrf.mxu1  ;;  %v2254_v9 = vadd.f32 %v2214_v60, %v2027_v0 }
 0x406   : > { %v2477_v7 = vadd.f32 %v2433_v58, %v2251_v49  ;;  %v327_v49 = vld [vmem:[%s3864_s9 + $0x28] sm:$0xff]  }
 0x407   : > { %3044 = vst.msk [vmem:[%s4727_s30 + $0x20] sm:$0xff] %vm465_vm0, %v3012_v14  ;;  %v2738_v53 = vadd.f32 %v4628_v47, %v2702_v63 }
 0x408   : > { %v2876_v30 = vpop.f32.mrf.mxu3 }
 0x409   : > { %v2770_v42 = vmax.f32 %v2738_v53, 0.0  ;;  %v2877_v1 = vadd.f32 %v4720_v28, %v2876_v30  ;;  %v2953_v30 = vunpack.c.h.bf16 %v325_v39 }
 0x40b   : > { %v2790_v56 = vpack.c.bf16 %v2770_v42, %v2769_v52  ;;  %v2981_v37 = vadd.f32 %v2949_v43, %v2877_v1 }
 0x40c   : > { %v2659_v48 = vpop.f32.mrf.mxu2 }
 0x40d   : > { %v3013_v10 = vmax.f32 %v2981_v37, 0.0  ;;  %3473 = vmatmul.msk.bf16.gmra.mxu3 %vm635_vm1, %v2790_v56  ;;  %v2435_v54 = vpop.f32.mrf.mxu1  ;;  %v2703_v32 = vadd.f32 %v2659_v48, %v2477_v7  ;;  %v2219_v37 = vpop.f32.mrf.mxu0  ;;  %v2029_v7 = vadd.f32 %v4612_v25, %v4610_v17 }
 0x40e   : > { %v2478_v27 = vadd.f32 %v2435_v54, %v2252_v33 }
 0x40f   : > { %3045 = vst.msk [vmem:[%s4727_s30 + $0x28] sm:$0xff] %vm465_vm0, %v3013_v10  ;;  %v2739_v59 = vadd.f32 %v4628_v47, %v2703_v32  ;;  %v2255_v10 = vadd.f32 %v2217_v19, %v4607_v61  ;;  %v2256_v32 = vadd.f32 %v2219_v37, %v2029_v7 }
 0x410   : > { %v2879_v29 = vpop.f32.mrf.mxu3 }
 0x411   : > { %v2880_v5 = vadd.f32 %v4720_v28, %v2879_v29  ;;  %v2771_v15 = vmax.f32 %v2739_v59, 0.0  ;;  %v2954_v29 = vunpack.c.l.bf16 %v327_v49 }
 0x413   : > { %v2982_v11 = vadd.f32 %v2950_v6, %v2880_v5 }
 0x414   : > { %v2661_v44 = vpop.f32.mrf.mxu2 }
 0x415   : > { %v3014_v35 = vmax.f32 %v2982_v11, 0.0  ;;  %v2704_v16 = vadd.f32 %v2661_v44, %v2478_v27  ;;  %v2438_v38 = vpop.f32.mrf.mxu1  ;;  %v2222_v61 = vpop.f32.mrf.mxu0 }
 0x416   : > { %v2479_v46 = vadd.f32 %v2438_v38, %v2253_v51  ;;  %v2955_v38 = vunpack.c.h.bf16 %v327_v49 }
 0x417   : > { %3046 = vst.msk [vmem:[%s4727_s30 + $0x30] sm:$0xff] %vm465_vm0, %v3014_v35  ;;  %v2740_v40 = vadd.f32 %v4628_v47, %v2704_v16 }
 0x418   : > { %v2881_v12 = vpop.f32.mrf.mxu3 }
 0x419   : > { %v2772_v36 = vmax.f32 %v2740_v40, 0.0  ;;  %v2882_v45 = vadd.f32 %v4720_v28, %v2881_v12 }
 0x41b   : > { %v2791_v18 = vpack.c.bf16 %v2772_v36, %v2771_v15  ;;  %v2983_v23 = vadd.f32 %v2951_v55, %v2882_v45 }
 0x41c   : > { %v2664_v62 = vpop.f32.mrf.mxu2 }
 0x41d   : > { %v3015_v22 = vmax.f32 %v2983_v23, 0.0  ;;  %3474 = vmatmul.msk.bf16.gmra.mxu3 %vm635_vm1, %v2791_v18  ;;  %v2440_v3 = vpop.f32.mrf.mxu1  ;;  %v2705_v57 = vadd.f32 %v2664_v62, %v2479_v46  ;;  %v329_v23 = vld [vmem:[%s3864_s9 + $0x30] sm:$0xff]   ;;  %v2257_v62 = vadd.f32 %v2222_v61, %v4617_v50  ;;  %v2224_v51 = vpop.f32.mrf.mxu0  ;;  %v335_v61 = vld [vmem:[%s3864_s9 + $0x48] sm:$0xff]  }
 0x41e   : > { %v2480_v14 = vadd.f32 %v2440_v3, %v2254_v9  ;;  %v2956_v0 = vunpack.c.l.bf16 %v329_v23 }
 0x41f   : > { %3047 = vst.msk [vmem:[%s4727_s30 + $0x38] sm:$0xff] %vm465_vm0, %v3015_v22  ;;  %v2741_v58 = vadd.f32 %v4628_v47, %v2705_v57  ;;  %v2031_v22 = vadd.f32 %v4712_v21, %v4620_v31  ;;  %v2957_v21 = vunpack.c.h.bf16 %v329_v23 }
 0x420   : > { %v2884_v20 = vpop.f32.mrf.mxu3 }
 0x421   : > { %v2885_v13 = vadd.f32 %v4720_v28, %v2884_v20  ;;  %v2773_v42 = vmax.f32 %v2741_v58, 0.0  ;;  %v2258_v19 = vadd.f32 %v2224_v51, %v2031_v22 }
 0x423   : > { %v2984_v8 = vadd.f32 %v2952_v26, %v2885_v13 }
 0x424   : > { %v2666_v63 = vpop.f32.mrf.mxu2 }
 0x425   : > { %v3016_v53 = vmax.f32 %v2984_v8, 0.0  ;;  %v2706_v43 = vadd.f32 %v2666_v63, %v2480_v14  ;;  %v2443_v34 = vpop.f32.mrf.mxu1 }
 0x426   : > { %v2481_v6 = vadd.f32 %v2443_v34, %v2255_v10 }
 0x427   : > { %3048 = vst.msk [vmem:[%s4727_s30 + $0x40] sm:$0xff] %vm465_vm0, %v3016_v53  ;;  %v2742_v4 = vadd.f32 %v4628_v47, %v2706_v43 }
 0x428   : > { %v2886_v52 = vpop.f32.mrf.mxu3 }
 0x429   : > { %v2774_v1 = vmax.f32 %v2742_v4, 0.0  ;;  %v2887_v56 = vadd.f32 %v4720_v28, %v2886_v52  ;;  %v331_v52 = vld [vmem:[%s3864_s9 + $0x38] sm:$0xff]  }
 0x42b   : > { %v2792_v41 = vpack.c.bf16 %v2774_v1, %v2773_v42  ;;  %v2985_v48 = vadd.f32 %v2953_v30, %v2887_v56  ;;  %v2958_v1 = vunpack.c.l.bf16 %v331_v52 }
 0x42c   : > { %v2669_v24 = vpop.f32.mrf.mxu2 }
 0x42d   : > { %v3017_v54 = vmax.f32 %v2985_v48, 0.0  ;;  %3475 = vmatmul.msk.bf16.gmra.mxu3 %vm635_vm1, %v2792_v41  ;;  %v2445_v2 = vpop.f32.mrf.mxu1  ;;  %v2707_v5 = vadd.f32 %v2669_v24, %v2481_v6  ;;  %v2959_v48 = vunpack.c.h.bf16 %v331_v52 }
 0x42e   : > { %v2482_v11 = vadd.f32 %v2445_v2, %v2256_v32 }
 0x42f   : > { %3049 = vst.msk [vmem:[%s4727_s30 + $0x48] sm:$0xff] %vm465_vm0, %v3017_v54  ;;  %v2743_v35 = vadd.f32 %v4628_v47, %v2707_v5  ;;  %v333_v54 = vld [vmem:[%s3864_s9 + $0x40] sm:$0xff]  }
 0x430   : > { %v2889_v33 = vpop.f32.mrf.mxu3  ;;  %v2960_v7 = vunpack.c.l.bf16 %v333_v54  ;;  %v2961_v5 = vunpack.c.h.bf16 %v333_v54 }
 0x431   : > { %v2890_v27 = vadd.f32 %v4720_v28, %v2889_v33  ;;  %v2775_v55 = vmax.f32 %v2743_v35, 0.0  ;;  %v2962_v35 = vunpack.c.l.bf16 %v335_v61 }
 0x433   : > { %v2986_v44 = vadd.f32 %v2954_v29, %v2890_v27 }
 0x434   : > { %v2671_v59 = vpop.f32.mrf.mxu2 }
 0x435   : > { %v3018_v16 = vmax.f32 %v2986_v44, 0.0  ;;  %v2708_v60 = vadd.f32 %v2671_v59, %v2482_v11  ;;  %v2448_v17 = vpop.f32.mrf.mxu1 }
 0x436   : > { %v2483_v3 = vadd.f32 %v2448_v17, %v2257_v62 }
 0x437   : > { %3050 = vst.msk [vmem:[%s4727_s30 + $0x50] sm:$0xff] %vm465_vm0, %v3018_v16  ;;  %v2744_v25 = vadd.f32 %v4628_v47, %v2708_v60 }
 0x438   : > { %v2891_v40 = vpop.f32.mrf.mxu3 }
 0x439   : > { %v2776_v12 = vmax.f32 %v2744_v25, 0.0  ;;  %v2892_v15 = vadd.f32 %v4720_v28, %v2891_v40 }
 0x43b   : > { %v2793_v36 = vpack.c.bf16 %v2776_v12, %v2775_v55  ;;  %v2987_v45 = vadd.f32 %v2955_v38, %v2892_v15  ;;  %v2963_v38 = vunpack.c.h.bf16 %v335_v61  ;;  %v337_v15 = vld [vmem:[%s3864_s9 + $0x50] sm:$0xff]  }
 0x43c   : > { %v2674_v18 = vpop.f32.mrf.mxu2  ;;  %v2965_v51 = vunpack.c.h.bf16 %v337_v15 }
 0x43d   : > { %v3019_v39 = vmax.f32 %v2987_v45, 0.0  ;;  %3476 = vmatmul.msk.bf16.gmra.mxu3 %vm635_vm1, %v2793_v36  ;;  %v2450_v46 = vpop.f32.mrf.mxu1  ;;  %v2709_v20 = vadd.f32 %v2674_v18, %v2483_v3  ;;  %v2964_v45 = vunpack.c.l.bf16 %v337_v15 }
 0x43e   : > { %v2484_v50 = vadd.f32 %v2450_v46, %v2258_v19  ;;  %v339_v46 = vld [vmem:[%s3864_s9 + $0x58] sm:$0xff]  }
 0x43f   : > { %3051 = vst.msk [vmem:[%s4727_s30 + $0x58] sm:$0xff] %vm465_vm0, %v3019_v39  ;;  %v2745_v14 = vadd.f32 %v4628_v47, %v2709_v20  ;;  %v2966_v19 = vunpack.c.l.bf16 %v339_v46 }
 0x440   : > { %v2894_v26 = vpop.f32.mrf.mxu3 }
 0x441   : > { %v2895_v9 = vadd.f32 %v4720_v28, %v2894_v26  ;;  %v2777_v53 = vmax.f32 %v2745_v14, 0.0 }
 0x443   : > { %v2988_v57 = vadd.f32 %v2956_v0, %v2895_v9 }
 0x444   : > { %v2676_v13 = vpop.f32.mrf.mxu2 }
 0x445   : > { %v3020_v8 = vmax.f32 %v2988_v57, 0.0  ;;  %v2710_v63 = vadd.f32 %v2676_v13, %v2484_v50  ;;  %v2967_v13 = vunpack.c.h.bf16 %v339_v46 }
 0x447   : > { %3052 = vst.msk [vmem:[%s4727_s30 + $0x60] sm:$0xff] %vm465_vm0, %v3020_v8  ;;  %v2746_v31 = vadd.f32 %v4628_v47, %v2710_v63 }
 0x448   : > { %v2896_v58 = vpop.f32.mrf.mxu3 }
 0x449   : > { %v2778_v43 = vmax.f32 %v2746_v31, 0.0  ;;  %v2897_v34 = vadd.f32 %v4720_v28, %v2896_v58  ;;  %v341_v31 = vld [vmem:[%s3864_s9 + $0x60] sm:$0xff]  }
 0x44a   : > { %v2968_v58 = vunpack.c.l.bf16 %v341_v31 }
 0x44b   : > { %v2794_v4 = vpack.c.bf16 %v2778_v43, %v2777_v53  ;;  %v2989_v30 = vadd.f32 %v2957_v21, %v2897_v34 }
 0x44d   : > { %v3021_v42 = vmax.f32 %v2989_v30, 0.0  ;;  %3477 = vmatmul.msk.bf16.gmra.mxu3 %vm635_vm1, %v2794_v4  ;;  %v2969_v30 = vunpack.c.h.bf16 %v341_v31 }
 0x44f   : > { %3053 = vst.msk [vmem:[%s4727_s30 + $0x68] sm:$0xff] %vm465_vm0, %v3021_v42 }
 0x450   : > { %v2899_v56 = vpop.f32.mrf.mxu3 }
 0x451   : > { %v2900_v47 = vadd.f32 %v4720_v28, %v2899_v56  ;;  %v343_v56 = vld [vmem:[%s3864_s9 + $0x68] sm:$0xff]  }
 0x453   : > { %v2990_v37 = vadd.f32 %v2958_v1, %v2900_v47 }
 0x455   : > { %v3022_v41 = vmax.f32 %v2990_v37, 0.0  ;;  %v2970_v37 = vunpack.c.l.bf16 %v343_v56 }
 0x457   : > { %3054 = vst.msk [vmem:[%s4727_s30 + $0x70] sm:$0xff] %vm465_vm0, %v3022_v41 }
 0x458   : > { %v2901_v24 = vpop.f32.mrf.mxu3 }
 0x459   : > { %v2902_v49 = vadd.f32 %v4720_v28, %v2901_v24 }
 0x45b   : > { %v2991_v10 = vadd.f32 %v2959_v48, %v2902_v49 }
 0x45d   : > { %v3023_v2 = vmax.f32 %v2991_v10, 0.0  ;;  %v2971_v10 = vunpack.c.h.bf16 %v343_v56 }
 0x45f   : > { %3055 = vst.msk [vmem:[%s4727_s30 + $0x78] sm:$0xff] %vm465_vm0, %v3023_v2 }
 0x460   : > { %v2904_v6 = vpop.f32.mrf.mxu3 }
 0x461   : > { %v2905_v29 = vadd.f32 %v4720_v28, %v2904_v6  ;;  %v345_v6 = vld [vmem:[%s3864_s9 + $0x70] sm:$0xff]  }
 0x463   : > { %v2992_v33 = vadd.f32 %v2960_v7, %v2905_v29 }
 0x465   : > { %v3024_v32 = vmax.f32 %v2992_v33, 0.0  ;;  %v2972_v33 = vunpack.c.l.bf16 %v345_v6 }
 0x467   : > { %3056 = vst.msk [vmem:[%s4727_s30 + $0x80] sm:$0xff] %vm465_vm0, %v3024_v32 }
 0x468   : > { %v2906_v27 = vpop.f32.mrf.mxu3 }
 0x469   : > { %v2907_v11 = vadd.f32 %v4720_v28, %v2906_v27 }
 0x46b   : > { %v2993_v44 = vadd.f32 %v2961_v5, %v2907_v11 }
 0x46d   : > { %v3025_v59 = vmax.f32 %v2993_v44, 0.0  ;;  %v2973_v44 = vunpack.c.h.bf16 %v345_v6 }
 0x46f   : > { %3057 = vst.msk [vmem:[%s4727_s30 + $0x88] sm:$0xff] %vm465_vm0, %v3025_v59 }
 0x470   : > { %v2909_v16 = vpop.f32.mrf.mxu3 }
 0x471   : > { %v2910_v60 = vadd.f32 %v4720_v28, %v2909_v16  ;;  %v347_v16 = vld [vmem:[%s3864_s9 + $0x78] sm:$0xff]   ;;  %s3085_s9 = sshll.u32 %s4727_s30, 4  ;;  %s3086_s9 = int_to_ptr.vmem [resolvable:$true] %s3085_s9 }
 0x473   : > { %v2994_v17 = vadd.f32 %v2962_v35, %v2910_v60 }
 0x475   : > { %v3026_v25 = vmax.f32 %v2994_v17, 0.0  ;;  %v2974_v17 = vunpack.c.l.bf16 %v347_v16 }
 0x477   : > { %3058 = vst.msk [vmem:[%s4727_s30 + $0x90] sm:$0xff] %vm465_vm0, %v3026_v25 }
 0x478   : > { %v2911_v40 = vpop.f32.mrf.mxu3 }
 0x479   : > { %v2912_v55 = vadd.f32 %v4720_v28, %v2911_v40 }
 0x47b   : > { %v2995_v12 = vadd.f32 %v2963_v38, %v2912_v55 }
 0x47d   : > { %v3027_v36 = vmax.f32 %v2995_v12, 0.0  ;;  %v2975_v12 = vunpack.c.h.bf16 %v347_v16 }
 0x47f   : > { %3059 = vst.msk [vmem:[%s4727_s30 + $0x98] sm:$0xff] %vm465_vm0, %v3027_v36 }
 0x480   : > { %v2914_v18 = vpop.f32.mrf.mxu3 }
 0x481   : > { %v2915_v23 = vadd.f32 %v4720_v28, %v2914_v18 }
 0x483   : > { %v2996_v62 = vadd.f32 %v2964_v45, %v2915_v23 }
 0x485   : > { %v3028_v39 = vmax.f32 %v2996_v62, 0.0 }
 0x487   : > { %3060 = vst.msk [vmem:[%s4727_s30 + $0xa0] sm:$0xff] %vm465_vm0, %v3028_v39 }
 0x488   : > { %v2916_v22 = vpop.f32.mrf.mxu3 }
 0x489   : > { %v2917_v3 = vadd.f32 %v4720_v28, %v2916_v22 }
 0x48b   : > { %v2997_v0 = vadd.f32 %v2965_v51, %v2917_v3 }
 0x48d   : > { %v3029_v26 = vmax.f32 %v2997_v0, 0.0 }
 0x48f   : > { %3061 = vst.msk [vmem:[%s4727_s30 + $0xa8] sm:$0xff] %vm465_vm0, %v3029_v26 }
 0x490   : > { %v2919_v20 = vpop.f32.mrf.mxu3 }
 0x491   : > { %v2920_v9 = vadd.f32 %v4720_v28, %v2919_v20 }
 0x493   : > { %v2998_v50 = vadd.f32 %v2966_v19, %v2920_v9 }
 0x495   : > { %v3030_v57 = vmax.f32 %v2998_v50, 0.0 }
 0x497   : > { %3062 = vst.msk [vmem:[%s4727_s30 + $0xb0] sm:$0xff] %vm465_vm0, %v3030_v57 }
 0x498   : > { %v2921_v14 = vpop.f32.mrf.mxu3 }
 0x499   : > { %v2922_v8 = vadd.f32 %v4720_v28, %v2921_v14 }
 0x49b   : > { %v2999_v63 = vadd.f32 %v2967_v13, %v2922_v8 }
 0x49d   : > { %v3031_v21 = vmax.f32 %v2999_v63, 0.0 }
 0x49f   : > { %3063 = vst.msk [vmem:[%s4727_s30 + $0xb8] sm:$0xff] %vm465_vm0, %v3031_v21 }
 0x4a0   : > { %v2924_v53 = vpop.f32.mrf.mxu3 }
 0x4a1   : > { %v2925_v43 = vadd.f32 %v4720_v28, %v2924_v53 }
 0x4a3   : > { %v3000_v34 = vadd.f32 %v2968_v58, %v2925_v43 }
 0x4a5   : > { %v3032_v4 = vmax.f32 %v3000_v34, 0.0 }
 0x4a7   : > { %3064 = vst.msk [vmem:[%s4727_s30 + $0xc0] sm:$0xff] %vm465_vm0, %v3032_v4 }
 0x4a8   : > { %v2926_v52 = vpop.f32.mrf.mxu3 }
 0x4a9   : > { %v2927_v42 = vadd.f32 %v4720_v28, %v2926_v52 }
 0x4ab   : > { %v3001_v1 = vadd.f32 %v2969_v30, %v2927_v42 }
 0x4ad   : > { %v3033_v47 = vmax.f32 %v3001_v1, 0.0 }
 0x4af   : > { %3065 = vst.msk [vmem:[%s4727_s30 + $0xc8] sm:$0xff] %vm465_vm0, %v3033_v47 }
 0x4b0   : > { %v2929_v41 = vpop.f32.mrf.mxu3 }
 0x4b1   : > { %v2930_v48 = vadd.f32 %v4720_v28, %v2929_v41 }
 0x4b3   : > { %v3002_v24 = vadd.f32 %v2970_v37, %v2930_v48 }
 0x4b5   : > { %v3034_v49 = vmax.f32 %v3002_v24, 0.0 }
 0x4b7   : > { %3066 = vst.msk [vmem:[%s4727_s30 + $0xd0] sm:$0xff] %vm465_vm0, %v3034_v49 }
 0x4b8   : > { %v2931_v54 = vpop.f32.mrf.mxu3 }
 0x4b9   : > { %v2932_v2 = vadd.f32 %v4720_v28, %v2931_v54 }
 0x4bb   : > { %v3003_v7 = vadd.f32 %v2971_v10, %v2932_v2 }
 0x4bd   : > { %v3035_v29 = vmax.f32 %v3003_v7, 0.0 }
 0x4bf   : > { %3067 = vst.msk [vmem:[%s4727_s30 + $0xd8] sm:$0xff] %vm465_vm0, %v3035_v29 }
 0x4c0   : > { %v2934_v32 = vpop.f32.mrf.mxu3 }
 0x4c1   : > { %v2935_v5 = vadd.f32 %v4720_v28, %v2934_v32 }
 0x4c3   : > { %v3004_v27 = vadd.f32 %v2972_v33, %v2935_v5 }
 0x4c5   : > { %v3036_v11 = vmax.f32 %v3004_v27, 0.0 }
 0x4c7   : > { %3068 = vst.msk [vmem:[%s4727_s30 + $0xe0] sm:$0xff] %vm465_vm0, %v3036_v11 }
 0x4c8   : > { %v2936_v61 = vpop.f32.mrf.mxu3 }
 0x4c9   : > { %v2937_v59 = vadd.f32 %v4720_v28, %v2936_v61 }
 0x4cb   : > { %v3005_v35 = vadd.f32 %v2973_v44, %v2937_v59 }
 0x4cd   : > { %v3037_v60 = vmax.f32 %v3005_v35, 0.0 }
 0x4cf   : > { %3069 = vst.msk [vmem:[%s4727_s30 + $0xe8] sm:$0xff] %vm465_vm0, %v3037_v60 }
 0x4d0   : > { %v2939_v25 = vpop.f32.mrf.mxu3 }
 0x4d1   : > { %v2940_v38 = vadd.f32 %v4720_v28, %v2939_v25 }
 0x4d3   : > { %v3006_v40 = vadd.f32 %v2974_v17, %v2940_v38 }
 0x4d5   : > { %v3038_v55 = vmax.f32 %v3006_v40, 0.0 }
 0x4d7   : > { %3070 = vst.msk [vmem:[%s4727_s30 + $0xf0] sm:$0xff] %vm465_vm0, %v3038_v55 }
 0x4d8   : > { %v2941_v15 = vpop.f32.mrf.mxu3 }
 0x4d9   : > { %v2942_v36 = vadd.f32 %v4720_v28, %v2941_v15 }
 0x4db   : > { %v3007_v45 = vadd.f32 %v2975_v12, %v2942_v36 }
 0x4dd   : > { %v3039_v18 = vmax.f32 %v3007_v45, 0.0 }
 0x4df   : > { %3071 = vst.msk [vmem:[%s4727_s30 + $0xf8] sm:$0xff] %vm465_vm0, %v3039_v18 }
 0x4e0   : > { %3670 = shalt.err (!%p3667_p10)
}
 0x4e1   : > { %s3719_s23 = smov 128   ;;  %s3720_s30 = smov 8  }
 0x4e2   : > { %3524 = dma.vmem_to_hbm [thread:$0]  (%p3830_p3), %s3086_s9, 4096, %s3088_s22, %s3073_s28, %s3719_s23, %s3719_s23, %s3720_s30  }
 0x4e3 PF: > { %s3102_s19 = sand.u32 1, %s3701_s24   ;;  %p4948_p12 = scmp.ge.s32.totalorder %s3713_s27, 2 }
 0x4e4   : > { %s3103_s29 = scalar_lea.sflag [#allocation5], %s3102_s19 }
 0x4e5   : > { %p3535_p13 = pnand %p4948_p12, %p3796_p6 }
 0x4e7   : > { %p3536_p0 = pneg %p3535_p13 }
 0x4e9   : > { %3696 = dma.done.wait (%p3536_p0), %s3103_s29, 4096  }
 0x4ea   : > { %3698 = vsyncadd (%p3536_p0), %s3103_s29, 4294963200  ;;  %p21_p5 = scmp.ge.s32.totalorder %s3814_s15, 4   ;;  %s4949_s24 = smov %s3705_s25 }
 0x4eb   : > { %s4950_s25 = smov %s3709_s26  ;;  %s4951_s26 = smov %s3826_s20 }
 0x4ec   : > { %s4952_s27 = smov %s3814_s15  ;;  %23 = sbr.rel (!%p21_p5) target bundleno = 8 (0x8), region = 107 }
 0x4f1   :  { %3109 = vsyncpa [#allocation4], 1 }
 0x4f2   :  { %3111 = vsyncpa [#allocation4 + $0x1], 1 }
 0x4f3   :  { %3112 = vsyncpa [#allocation7], 1 }
 0x4f4   :  { %3113 = vsyncpa [#allocation5], 1 }
 0x4f5   :  { %3115 = vsyncpa [#allocation5 + $0x1], 1 }

</bundles_post_ra>
